<compile_context>
chip_gen: v6e
topology: v6e:2x2x1
jax: 0.10.0
libtpu: 0.0.40
codegen_flags: <defaults>
</compile_context>

<pallas_src>
import functools

import jax
import jax.numpy as jnp
import numpy as np
from jax.experimental import pallas as pl
from jax.experimental.pallas import tpu as pltpu


def _vmem_limit_bytes():
    try:
        phys = pltpu.get_tpu_info().vmem_capacity_bytes
    except Exception:
        phys = 64 * 1024 * 1024            # conservative fallback (v7x per-TC size)
    return int(min(96 * 1024 * 1024, phys * 3 // 4))


VMEM_LIMIT = _vmem_limit_bytes()


def _round_up(x, m):
    return (x + m - 1) // m * m


def _pick_tile(dim, target, align):
    """Largest tile <= target that divides dim and is a multiple of `align`, else the full dim."""
    if dim <= target:
        return dim
    t = (target // align) * align
    while t >= align:
        if dim % t == 0:
            return t
        t -= align
    return dim


# ----------------------------------------------------------------------------
# Fused tiled matmul kernel:  y = act( [LN(x)] @ W + b [+ residual] )
# ----------------------------------------------------------------------------
def _make_linear_kernel(activation, has_bias, has_ln, has_residual, out_dtype):
    def kernel(*refs):
        idx = 0
        x_ref = refs[idx]; idx += 1
        w_ref = refs[idx]; idx += 1
        b_ref = g_ref = be_ref = r_ref = None
        if has_bias:
            b_ref = refs[idx]; idx += 1
        if has_ln:
            g_ref = refs[idx]; be_ref = refs[idx + 1]; idx += 2
        if has_residual:
            r_ref = refs[idx]; idx += 1
        o_ref = refs[idx]; idx += 1
        acc_ref = refs[idx]; idx += 1
        xln_ref = refs[idx] if has_ln else None

        j = pl.program_id(1)
        k_id = pl.program_id(2)

        @pl.when(k_id == 0)
        def _init():
            acc_ref[...] = jnp.zeros_like(acc_ref)

        if has_ln:
            # bk == K: the x block is constant across the N axis, so LayerNorm (+ bf16 cast) is
            # computed once per row tile and cached in VMEM, not once per (i, j) grid step.
            @pl.when(j == 0)
            def _compute_ln():
                x = x_ref[...].astype(jnp.float32)
                mu = jnp.mean(x, axis=-1, keepdims=True)
                xc = x - mu
                var = jnp.mean(xc * xc, axis=-1, keepdims=True)
                y = xc * jax.lax.rsqrt(var + 1e-5) * g_ref[...] + be_ref[...]
                xln_ref[...] = y.astype(jnp.bfloat16)

            x_mxu = xln_ref[...]
        else:
            x_mxu = x_ref[...].astype(jnp.bfloat16)

        acc_ref[...] += jnp.dot(x_mxu, w_ref[...].astype(jnp.bfloat16),
                                preferred_element_type=jnp.float32)

        @pl.when(k_id == pl.num_programs(2) - 1)
        def _finalize():
            y = acc_ref[...]
            if has_bias:
                y = y + b_ref[...]
            if has_residual:
                y = y + r_ref[...].astype(jnp.float32)
            if activation == "gelu":
                # TODO(synk): HF Whisper uses erf-exact GELU; tanh approximation used here.
                y = jax.nn.gelu(y, approximate=True)
            elif activation == "relu":
                y = jnp.maximum(y, 0.0)
            o_ref[...] = y.astype(out_dtype)

    return kernel


def fused_linear(x, w, b=None, *, ln=None, residual=None, activation="none",
                 out_dtype=jnp.bfloat16, tm=256, tn=1024, tk=512):
    """x: (M, K) f32/bf16; w: (K, N) bf16; b: (N,) f32 or None.
    ln=(gamma, beta): fuse LayerNorm(x) before the matmul (full-K blocks, cached per row tile).
    residual: (M, N) added (in f32) before the activation. Output dtype = out_dtype."""
    M, K = x.shape
    K2, N = w.shape
    assert K2 == K and M % 8 == 0, "pad M (= B*S_pad) to a multiple of 8 before calling"
    has_bias = b is not None
    has_ln = ln is not None
    has_residual = residual is not None

    bm = _pick_tile(M, tm, 8)
    bn = _pick_tile(N, tn, 128)
    bk = K if has_ln else _pick_tile(K, tk, 128)
    grid = (M // bm, N // bn, K // bk)

    in_specs = [
        pl.BlockSpec((bm, bk), lambda i, j, k: (i, k)),
        pl.BlockSpec((bk, bn), lambda i, j, k: (k, j)),
    ]
    args = [x, w]
    if has_bias:
        in_specs.append(pl.BlockSpec((1, bn), lambda i, j, k: (0, j)))
        args.append(b.reshape(1, N).astype(jnp.float32))
    if has_ln:
        g, be = ln
        in_specs.append(pl.BlockSpec((1, bk), lambda i, j, k: (0, k)))
        in_specs.append(pl.BlockSpec((1, bk), lambda i, j, k: (0, k)))
        args.append(g.reshape(1, K).astype(jnp.float32))
        args.append(be.reshape(1, K).astype(jnp.float32))
    if has_residual:
        in_specs.append(pl.BlockSpec((bm, bn), lambda i, j, k: (i, j)))
        args.append(residual)

    scratch_shapes = [pltpu.VMEM((bm, bn), jnp.float32)]
    if has_ln:
        scratch_shapes.append(pltpu.VMEM((bm, bk), jnp.bfloat16))

    # When LN is cached across the N axis, keep that axis "arbitrary" so megacore never splits a
    # row tile's N loop across TensorCores (the scratch would be uninitialized on the second TC).
    dims = ("parallel", "arbitrary", "arbitrary") if has_ln else \
           ("parallel", "parallel", "arbitrary")

    kernel = _make_linear_kernel(activation, has_bias, has_ln, has_residual, out_dtype)
    return pl.pallas_call(
        kernel,
        out_shape=jax.ShapeDtypeStruct((M, N), out_dtype),
        grid=grid,
        in_specs=in_specs,
        out_specs=pl.BlockSpec((bm, bn), lambda i, j, k: (i, j)),
        scratch_shapes=scratch_shapes,
        compiler_params=pltpu.CompilerParams(
            dimension_semantics=dims, vmem_limit_bytes=VMEM_LIMIT),
    )(*args)


# ----------------------------------------------------------------------------
# Flash-style attention: grid over (B*H, Q tiles, KV tiles), online softmax.
# ----------------------------------------------------------------------------
def _make_flash_kernel(kv_valid, tkv):
    def kernel(q_ref, k_ref, v_ref, o_ref, m_sc, l_sc, acc_sc):
        kj = pl.program_id(2)

        @pl.when(kj == 0)
        def _init():
            m_sc[...] = jnp.full_like(m_sc, -jnp.inf)
            l_sc[...] = jnp.zeros_like(l_sc)
            acc_sc[...] = jnp.zeros_like(acc_sc)

        q = q_ref[0]            # (tq, Dh)  bf16, scaling already folded into q_proj
        k = k_ref[0]            # (tkv, Dh) bf16
        v = v_ref[0]            # (tkv, Dh) bf16

        # contract last dims (no explicit transpose -> no XLU shuffle)
        s = jax.lax.dot_general(q, k, dimension_numbers=(((1,), (1,)), ((), ())),
                                preferred_element_type=jnp.float32)          # (tq, tkv)
        if kv_valid is not None:
            col = kj * tkv + jax.lax.broadcasted_iota(jnp.int32, s.shape, 1)
            s = jnp.where(col < kv_valid, s, -1e30)

        m_prev = m_sc[...]                                                   # (tq, 1)
        m_new = jnp.maximum(m_prev, jnp.max(s, axis=-1, keepdims=True))
        alpha = jnp.exp(m_prev - m_new)
        p = jnp.exp(s - m_new)
        l_sc[...] = alpha * l_sc[...] + jnp.sum(p, axis=-1, keepdims=True)
        acc_sc[...] = alpha * acc_sc[...] + jnp.dot(p.astype(jnp.bfloat16), v,
                                                    preferred_element_type=jnp.float32)
        m_sc[...] = m_new

        @pl.when(kj == pl.num_programs(2) - 1)
        def _finalize():
            o_ref[0] = (acc_sc[...] *
                        pl.reciprocal(l_sc[...], approx=False)).astype(o_ref.dtype)

    return kernel


def flash_attention(q, k, v, *, kv_valid=None):
    """q, k, v: (B*H, S_pad, Dh) bf16 -> (B*H, S_pad, Dh) bf16.
    kv_valid: number of valid key positions (static); keys >= kv_valid are masked out."""
    BH, S, Dh = q.shape
    assert S % 8 == 0
    tq = _pick_tile(S, 256, 8)
    tkv = _pick_tile(S, 512, 128 if S % 128 == 0 else 8)
    # invariant: at least one valid key per kv block (otherwise the online softmax would see an
    # all-masked block); guaranteed because padding < tkv.
    assert kv_valid is None or (S - kv_valid) < tkv
    grid = (BH, S // tq, S // tkv)

    q_spec = pl.BlockSpec((1, tq, Dh), lambda i, qi, kj: (i, qi, 0))
    kv_spec = pl.BlockSpec((1, tkv, Dh), lambda i, qi, kj: (i, kj, 0))
    return pl.pallas_call(
        _make_flash_kernel(kv_valid, tkv),
        out_shape=jax.ShapeDtypeStruct((BH, S, Dh), jnp.bfloat16),
        grid=grid,
        in_specs=[q_spec, kv_spec, kv_spec],
        out_specs=q_spec,
        scratch_shapes=[pltpu.VMEM((tq, 1), jnp.float32),
                        pltpu.VMEM((tq, 1), jnp.float32),
                        pltpu.VMEM((tq, Dh), jnp.float32)],
        compiler_params=pltpu.CompilerParams(
            dimension_semantics=("parallel", "parallel", "arbitrary"),
            vmem_limit_bytes=VMEM_LIMIT),
    )(q, k, v)


# ----------------------------------------------------------------------------
# WhisperEncoderLayer forward (eval mode: dropout=identity, no LoRA/adapter/wg,
# attention_mask / layer_head_mask assumed None).
# ----------------------------------------------------------------------------
def whisper_encoder_layer(h, p, num_heads):
    """h: (B, S, D) f32 hidden states -> (B, S, D) f32."""
    B, S, D = h.shape
    Dh = D // num_heads

    # Pad the sequence to a lane/sublane-friendly length (e.g. 1500 -> 1536); padded keys are
    # masked inside the attention kernel, padded rows are sliced off at the end.
    S_pad = _round_up(S, 128) if S > 128 else _round_up(S, 8)
    if S_pad != S:
        h = jnp.pad(h, ((0, 0), (0, S_pad - S), (0, 0)))
    M = B * S_pad

    # Residual stream carried in bf16 between kernels (accumulation inside kernels stays f32).
    hs = h.reshape(M, D).astype(jnp.bfloat16)

    # --- self-attention block: LN fused into the joint QKV projection (scaling folded into q) ---
    qkv = fused_linear(hs, p["qkv_w"], p["qkv_b"], ln=(p["ln1_g"], p["ln1_b"]))   # (M, 3D) bf16
    q, k, v = qkv[:, :D], qkv[:, D:2 * D], qkv[:, 2 * D:]

    def to_heads(t):   # cheap bf16 XLA reshape/transpose (see TODO at top of file)
        return (t.reshape(B, S_pad, num_heads, Dh)
                 .transpose(0, 2, 1, 3).reshape(B * num_heads, S_pad, Dh))

    attn = flash_attention(to_heads(q), to_heads(k), to_heads(v),
                           kv_valid=S if S_pad != S else None)
    attn = (attn.reshape(B, num_heads, S_pad, Dh)
                .transpose(0, 2, 1, 3).reshape(M, D))

    hs = fused_linear(attn, p["o_w"], p["o_b"], residual=hs)          # out_proj + residual add

    # --- feed-forward block: LN fused into fc1(+GELU); residual fused into fc2 ---
    x = fused_linear(hs, p["fc1_w"], p["fc1_b"], ln=(p["ln2_g"], p["ln2_b"]), activation="gelu")
    out = fused_linear(x, p["fc2_w"], p["fc2_b"], residual=hs, out_dtype=jnp.float32)

    out = out.reshape(B, S_pad, D)
    if S_pad != S:
        out = out[:, :S, :]
    return out


# ----------------------------------------------------------------------------
# Deterministic parameter init. Weights stored transposed vs torch ((in, out) layout), matmul
# weights in bf16; biases / LN params in f32.  The 1/sqrt(Dh) scaling and the zero k_proj bias
# are folded into the fused QKV weight/bias.
# ----------------------------------------------------------------------------
def init_params(key, *, d_model, ffn_dim, num_heads):
    D = d_model
    scaling = (D // num_heads) ** -0.5
    keys = jax.random.split(key, 16)
    counter = iter(range(16))

    def nrm(shape, scale=0.02):
        return scale * jax.random.normal(keys[next(counter)], shape, dtype=jnp.float32)

    q_w, q_b = nrm((D, D)), nrm((D,))
    k_w = nrm((D, D))                      # k_proj has bias=False
    v_w, v_b = nrm((D, D)), nrm((D,))
    return {
        "ln1_g": jnp.ones((D,), jnp.float32), "ln1_b": jnp.zeros((D,), jnp.float32),
        "qkv_w": jnp.concatenate([q_w * scaling, k_w, v_w], axis=1).astype(jnp.bfloat16),
        "qkv_b": jnp.concatenate([q_b * scaling, jnp.zeros((D,), jnp.float32), v_b]),
        "o_w": nrm((D, D)).astype(jnp.bfloat16), "o_b": nrm((D,)),
        "ln2_g": jnp.ones((D,), jnp.float32), "ln2_b": jnp.zeros((D,), jnp.float32),
        "fc1_w": nrm((D, ffn_dim)).astype(jnp.bfloat16), "fc1_b": nrm((ffn_dim,)),
        "fc2_w": nrm((ffn_dim, D)).astype(jnp.bfloat16), "fc2_b": nrm((D,)),
    }


# ----------------------------------------------------------------------------
# Pure-JAX f32 reference (same folded bf16 weights) for a sanity check.
# ----------------------------------------------------------------------------
def reference_layer(h, p, num_heads):
    B, S, D = h.shape
    Dh = D // num_heads
    f32 = lambda t: t.astype(jnp.float32)

    def ln(x, g, b):
        mu = x.mean(-1, keepdims=True)
        xc = x - mu
        var = (xc * xc).mean(-1, keepdims=True)
        return xc * jax.lax.rsqrt(var + 1e-5) * g + b

    res = h
    x = ln(h, p["ln1_g"], p["ln1_b"])
    qkv = x @ f32(p["qkv_w"]) + p["qkv_b"]
    q, k, v = jnp.split(qkv, 3, axis=-1)

    def heads(t):
        return t.reshape(B, S, num_heads, Dh).transpose(0, 2, 1, 3)

    q, k, v = heads(q), heads(k), heads(v)
    s = jnp.einsum("bhqd,bhkd->bhqk", q, k)
    a = jax.nn.softmax(s, axis=-1)
    o = jnp.einsum("bhqk,bhkd->bhqd", a, v).transpose(0, 2, 1, 3).reshape(B, S, D)
    h = res + (o @ f32(p["o_w"]) + p["o_b"])
    res = h
    x = ln(h, p["ln2_g"], p["ln2_b"])
    x = jax.nn.gelu(x @ f32(p["fc1_w"]) + p["fc1_b"], approximate=True)
    return res + (x @ f32(p["fc2_w"]) + p["fc2_b"])


# ----------------------------------------------------------------------------
if __name__ == "__main__":
    # Small synthetic Whisper-like config; S=12 exercises the pad-to-multiple-of-8 + key masking.
    B, S, d_model, num_heads, ffn_dim = 2, 12, 64, 4, 128

    key = jax.random.PRNGKey(0)
    k_param, k_h = jax.random.split(key)
    params = init_params(k_param, d_model=d_model, ffn_dim=ffn_dim, num_heads=num_heads)
    h = jax.random.normal(k_h, (B, S, d_model), dtype=jnp.float32)

    fwd = jax.jit(functools.partial(whisper_encoder_layer, num_heads=num_heads))
    out = fwd(h, params)
    jax.block_until_ready(out)

    assert out.shape == (B, S, d_model) and out.dtype == jnp.float32

    ref = reference_layer(h, params, num_heads)
    np.testing.assert_allclose(np.asarray(out), np.asarray(ref), atol=3e-2, rtol=3e-2)

    print("KERNEL_OK")
</pallas_src>

<mosaic_0001>
module attributes {stable_mosaic.version = 11 : i64} {
  func.func @kernel(%arg0: i32, %arg1: i32, %arg2: i32, %arg3: memref<32x64xbf16, #tpu.memory_space<vmem>>, %arg4: memref<64x192xbf16, #tpu.memory_space<vmem>>, %arg5: memref<1x192xf32, #tpu.memory_space<vmem>>, %arg6: memref<1x64xf32, #tpu.memory_space<vmem>>, %arg7: memref<1x64xf32, #tpu.memory_space<vmem>>, %arg8: memref<32x192xbf16, #tpu.memory_space<vmem>>, %arg9: memref<32x192xf32, #tpu.memory_space<vmem>>, %arg10: memref<32x64xbf16, #tpu.memory_space<vmem>>) attributes {dimension_semantics = [#tpu.dimension_semantics<parallel>, #tpu.dimension_semantics<arbitrary>, #tpu.dimension_semantics<arbitrary>], iteration_bounds = array<i64: 1, 1, 1>, scalar_prefetch = 0 : i64, scratch_operands = 2 : i64, tpu.core_type = #tpu.core_type<tc>, window_params = [{transform_indices = @transform_0, window_bounds = array<i64: 32, 64>}, {transform_indices = @transform_1, window_bounds = array<i64: 64, 192>}, {transform_indices = @transform_2, window_bounds = array<i64: 1, 192>}, {transform_indices = @transform_3, window_bounds = array<i64: 1, 64>}, {transform_indices = @transform_4, window_bounds = array<i64: 1, 64>}, {transform_indices = @transform_5, window_bounds = array<i64: 32, 192>}]} {
    %c0_i32 = arith.constant 0 : i32
    %0 = arith.cmpi eq, %arg2, %c0_i32 : i32
    %1 = arith.extui %0 : i1 to i32
    %c0_i32_0 = arith.constant 0 : i32
    %2 = arith.cmpi ne, %1, %c0_i32_0 : i32
    scf.if %2 {
      %cst_12 = arith.constant 0.000000e+00 : f32
      %15 = vector.broadcast %cst_12 : f32 to vector<32x192xf32>
      %c0_13 = arith.constant 0 : index
      %c0_14 = arith.constant 0 : index
      %16 = vector.load %arg9[%c0_13, %c0_14] : memref<32x192xf32, #tpu.memory_space<vmem>>, vector<32x192xf32>
      tpu.vector_store %arg9[%c0_13, %c0_14], %15 {strides = array<i32>} : memref<32x192xf32, #tpu.memory_space<vmem>>, vector<32x192xf32>,
    } else {
    }
    %c0_i32_1 = arith.constant 0 : i32
    %3 = arith.cmpi eq, %arg1, %c0_i32_1 : i32
    %4 = arith.extui %3 : i1 to i32
    %c0_i32_2 = arith.constant 0 : i32
    %5 = arith.cmpi ne, %4, %c0_i32_2 : i32
    scf.if %5 {
      %c0_12 = arith.constant 0 : index
      %c0_13 = arith.constant 0 : index
      %15 = vector.load %arg3[%c0_12, %c0_13] : memref<32x64xbf16, #tpu.memory_space<vmem>>, vector<32x64xbf16>
      %16 = arith.extf %15 : vector<32x64xbf16> to vector<32x64xf32>
      %cst_14 = arith.constant dense<0.000000e+00> : vector<32xf32>
      %17 = vector.multi_reduction <add>, %16, %cst_14 [1] : vector<32x64xf32> to vector<32xf32>
      %18 = vector.shape_cast %17 : vector<32xf32> to vector<32x1xf32>
      %cst_15 = arith.constant 6.400000e+01 : f32
      %19 = vector.broadcast %cst_15 : f32 to vector<32x1xf32>
      %20 = arith.divf %18, %19 : vector<32x1xf32>
      %21 = vector.broadcast %20 : vector<32x1xf32> to vector<32x64xf32>
      %22 = arith.subf %16, %21 : vector<32x64xf32>
      %23 = arith.mulf %22, %22 : vector<32x64xf32>
      %cst_16 = arith.constant dense<0.000000e+00> : vector<32xf32>
      %24 = vector.multi_reduction <add>, %23, %cst_16 [1] : vector<32x64xf32> to vector<32xf32>
      %25 = vector.shape_cast %24 : vector<32xf32> to vector<32x1xf32>
      %cst_17 = arith.constant 6.400000e+01 : f32
      %26 = vector.broadcast %cst_17 : f32 to vector<32x1xf32>
      %27 = arith.divf %25, %26 : vector<32x1xf32>
      %cst_18 = arith.constant 9.99999974E-6 : f32
      %28 = vector.broadcast %cst_18 : f32 to vector<32x1xf32>
      %29 = arith.addf %27, %28 : vector<32x1xf32>
      %30 = math.rsqrt %29 : vector<32x1xf32>
      %31 = vector.broadcast %30 : vector<32x1xf32> to vector<32x64xf32>
      %32 = arith.mulf %22, %31 : vector<32x64xf32>
      %c0_19 = arith.constant 0 : index
      %c0_20 = arith.constant 0 : index
      %33 = vector.load %arg6[%c0_19, %c0_20] : memref<1x64xf32, #tpu.memory_space<vmem>>, vector<1x64xf32>
      %34 = vector.broadcast %33 : vector<1x64xf32> to vector<32x64xf32>
      %35 = arith.mulf %32, %34 : vector<32x64xf32>
      %c0_21 = arith.constant 0 : index
      %c0_22 = arith.constant 0 : index
      %36 = vector.load %arg7[%c0_21, %c0_22] : memref<1x64xf32, #tpu.memory_space<vmem>>, vector<1x64xf32>
      %37 = vector.broadcast %36 : vector<1x64xf32> to vector<32x64xf32>
      %38 = arith.addf %35, %37 : vector<32x64xf32>
      %39 = arith.truncf %38 : vector<32x64xf32> to vector<32x64xbf16>
      %c0_23 = arith.constant 0 : index
      %c0_24 = arith.constant 0 : index
      %40 = vector.load %arg10[%c0_23, %c0_24] : memref<32x64xbf16, #tpu.memory_space<vmem>>, vector<32x64xbf16>
      tpu.vector_store %arg10[%c0_23, %c0_24], %39 {strides = array<i32>} : memref<32x64xbf16, #tpu.memory_space<vmem>>, vector<32x64xbf16>,
    } else {
    }
    %c0 = arith.constant 0 : index
    %c0_3 = arith.constant 0 : index
    %6 = vector.load %arg10[%c0, %c0_3] : memref<32x64xbf16, #tpu.memory_space<vmem>>, vector<32x64xbf16>
    %c0_4 = arith.constant 0 : index
    %c0_5 = arith.constant 0 : index
    %7 = vector.load %arg9[%c0_4, %c0_5] : memref<32x192xf32, #tpu.memory_space<vmem>>, vector<32x192xf32>
    %c0_6 = arith.constant 0 : index
    %c0_7 = arith.constant 0 : index
    %8 = vector.load %arg4[%c0_6, %c0_7] : memref<64x192xbf16, #tpu.memory_space<vmem>>, vector<64x192xbf16>
    %cst = arith.constant dense<0.000000e+00> : vector<32x192xf32>
    %9 = tpu.matmul %6, %8, %cst {dimension_numbers = #tpu.dot_dimension_numbers<[1], [0], [0], [1], [0, 0, 1, 1], [], []>} : vector<32x64xbf16>, vector<64x192xbf16>, vector<32x192xf32> -> vector<32x192xf32>
    %10 = arith.addf %7, %9 : vector<32x192xf32>
    %c0_8 = arith.constant 0 : index
    %c0_9 = arith.constant 0 : index
    %11 = vector.load %arg9[%c0_8, %c0_9] : memref<32x192xf32, #tpu.memory_space<vmem>>, vector<32x192xf32>
    tpu.vector_store %arg9[%c0_8, %c0_9], %10 {strides = array<i32>} : memref<32x192xf32, #tpu.memory_space<vmem>>, vector<32x192xf32>,
    %c0_i32_10 = arith.constant 0 : i32
    %12 = arith.cmpi eq, %arg2, %c0_i32_10 : i32
    %13 = arith.extui %12 : i1 to i32
    %c0_i32_11 = arith.constant 0 : i32
    %14 = arith.cmpi ne, %13, %c0_i32_11 : i32
    scf.if %14 {
      %c0_12 = arith.constant 0 : index
      %c0_13 = arith.constant 0 : index
      %15 = vector.load %arg9[%c0_12, %c0_13] : memref<32x192xf32, #tpu.memory_space<vmem>>, vector<32x192xf32>
      %c0_14 = arith.constant 0 : index
      %c0_15 = arith.constant 0 : index
      %16 = vector.load %arg5[%c0_14, %c0_15] : memref<1x192xf32, #tpu.memory_space<vmem>>, vector<1x192xf32>
      %17 = vector.broadcast %16 : vector<1x192xf32> to vector<32x192xf32>
      %18 = arith.addf %15, %17 : vector<32x192xf32>
      %19 = arith.truncf %18 : vector<32x192xf32> to vector<32x192xbf16>
      %c0_16 = arith.constant 0 : index
      %c0_17 = arith.constant 0 : index
      %20 = vector.load %arg8[%c0_16, %c0_17] : memref<32x192xbf16, #tpu.memory_space<vmem>>, vector<32x192xbf16>
      tpu.vector_store %arg8[%c0_16, %c0_17], %19 {strides = array<i32>} : memref<32x192xbf16, #tpu.memory_space<vmem>>, vector<32x192xbf16>,
    } else {
    }
    return
  }
  func.func @transform_0(%arg0: i32, %arg1: i32, %arg2: i32) -> (i32, i32) {
    %c0_i32 = arith.constant 0 : i32
    return %arg0, %arg2 : i32, i32
  }
  func.func @transform_1(%arg0: i32, %arg1: i32, %arg2: i32) -> (i32, i32) {
    %c0_i32 = arith.constant 0 : i32
    return %arg2, %arg1 : i32, i32
  }
  func.func @transform_2(%arg0: i32, %arg1: i32, %arg2: i32) -> (i32, i32) {
    %c0_i32 = arith.constant 0 : i32
    %c0_i32_0 = arith.constant 0 : i32
    return %c0_i32, %arg1 : i32, i32
  }
  func.func @transform_3(%arg0: i32, %arg1: i32, %arg2: i32) -> (i32, i32) {
    %c0_i32 = arith.constant 0 : i32
    %c0_i32_0 = arith.constant 0 : i32
    return %c0_i32, %arg2 : i32, i32
  }
  func.func @transform_4(%arg0: i32, %arg1: i32, %arg2: i32) -> (i32, i32) {
    %c0_i32 = arith.constant 0 : i32
    %c0_i32_0 = arith.constant 0 : i32
    return %c0_i32, %arg2 : i32, i32
  }
  func.func @transform_5(%arg0: i32, %arg1: i32, %arg2: i32) -> (i32, i32) {
    %c0_i32 = arith.constant 0 : i32
    return %arg0, %arg1 : i32, i32
  }
}

module attributes {stable_mosaic.version = 11 : i64} {
  func.func @kernel(%arg0: i32, %arg1: i32, %arg2: i32, %arg3: memref<1x16x16xbf16, #tpu.memory_space<vmem>>, %arg4: memref<1x16x16xbf16, #tpu.memory_space<vmem>>, %arg5: memref<1x16x16xbf16, #tpu.memory_space<vmem>>, %arg6: memref<1x16x16xbf16, #tpu.memory_space<vmem>>, %arg7: memref<16x1xf32, #tpu.memory_space<vmem>>, %arg8: memref<16x1xf32, #tpu.memory_space<vmem>>, %arg9: memref<16x16xf32, #tpu.memory_space<vmem>>) attributes {dimension_semantics = [#tpu.dimension_semantics<parallel>, #tpu.dimension_semantics<parallel>, #tpu.dimension_semantics<arbitrary>], iteration_bounds = array<i64: 8, 1, 1>, scalar_prefetch = 0 : i64, scratch_operands = 3 : i64, tpu.core_type = #tpu.core_type<tc>, window_params = [{transform_indices = @transform_0, window_bounds = array<i64: 1, 16, 16>}, {transform_indices = @transform_1, window_bounds = array<i64: 1, 16, 16>}, {transform_indices = @transform_2, window_bounds = array<i64: 1, 16, 16>}, {transform_indices = @transform_3, window_bounds = array<i64: 1, 16, 16>}]} {
    %c0_i32 = arith.constant 0 : i32
    %0 = arith.cmpi eq, %arg2, %c0_i32 : i32
    %1 = arith.extui %0 : i1 to i32
    %c0_i32_0 = arith.constant 0 : i32
    %2 = arith.cmpi ne, %1, %c0_i32_0 : i32
    scf.if %2 {
      %cst_27 = arith.constant 0xFF800000 : f32
      %44 = vector.broadcast %cst_27 : f32 to vector<16x1xf32>
      %c0_28 = arith.constant 0 : index
      %c0_29 = arith.constant 0 : index
      %45 = vector.load %arg7[%c0_28, %c0_29] : memref<16x1xf32, #tpu.memory_space<vmem>>, vector<16x1xf32>
      tpu.vector_store %arg7[%c0_28, %c0_29], %44 {strides = array<i32>} : memref<16x1xf32, #tpu.memory_space<vmem>>, vector<16x1xf32>,
      %cst_30 = arith.constant 0.000000e+00 : f32
      %46 = vector.broadcast %cst_30 : f32 to vector<16x1xf32>
      %c0_31 = arith.constant 0 : index
      %c0_32 = arith.constant 0 : index
      %47 = vector.load %arg8[%c0_31, %c0_32] : memref<16x1xf32, #tpu.memory_space<vmem>>, vector<16x1xf32>
      tpu.vector_store %arg8[%c0_31, %c0_32], %46 {strides = array<i32>} : memref<16x1xf32, #tpu.memory_space<vmem>>, vector<16x1xf32>,
      %cst_33 = arith.constant 0.000000e+00 : f32
      %48 = vector.broadcast %cst_33 : f32 to vector<16x16xf32>
      %c0_34 = arith.constant 0 : index
      %c0_35 = arith.constant 0 : index
      %49 = vector.load %arg9[%c0_34, %c0_35] : memref<16x16xf32, #tpu.memory_space<vmem>>, vector<16x16xf32>
      tpu.vector_store %arg9[%c0_34, %c0_35], %48 {strides = array<i32>} : memref<16x16xf32, #tpu.memory_space<vmem>>, vector<16x16xf32>,
    } else {
    }
    %c0 = arith.constant 0 : index
    %c0_1 = arith.constant 0 : index
    %c0_2 = arith.constant 0 : index
    %3 = vector.load %arg3[%c0, %c0_1, %c0_2] : memref<1x16x16xbf16, #tpu.memory_space<vmem>>, vector<1x16x16xbf16>
    %4 = vector.shape_cast %3 : vector<1x16x16xbf16> to vector<16x16xbf16>
    %c0_3 = arith.constant 0 : index
    %c0_4 = arith.constant 0 : index
    %c0_5 = arith.constant 0 : index
    %5 = vector.load %arg4[%c0_3, %c0_4, %c0_5] : memref<1x16x16xbf16, #tpu.memory_space<vmem>>, vector<1x16x16xbf16>
    %6 = vector.shape_cast %5 : vector<1x16x16xbf16> to vector<16x16xbf16>
    %c0_6 = arith.constant 0 : index
    %c0_7 = arith.constant 0 : index
    %c0_8 = arith.constant 0 : index
    %7 = vector.load %arg5[%c0_6, %c0_7, %c0_8] : memref<1x16x16xbf16, #tpu.memory_space<vmem>>, vector<1x16x16xbf16>
    %8 = vector.shape_cast %7 : vector<1x16x16xbf16> to vector<16x16xbf16>
    %cst = arith.constant dense<0.000000e+00> : vector<16x16xf32>
    %9 = tpu.matmul %4, %6, %cst {dimension_numbers = #tpu.dot_dimension_numbers<[1], [1], [0], [0], [0, 0, 1, 0], [], []>} : vector<16x16xbf16>, vector<16x16xbf16>, vector<16x16xf32> -> vector<16x16xf32>
    %c16_i32 = arith.constant 16 : i32
    %10 = arith.muli %arg2, %c16_i32 : i32
    %11 = tpu.iota {dimensions = array<i32: 1>} : vector<16x16xi32>
    %12 = vector.broadcast %10 : i32 to vector<16x16xi32>
    %13 = arith.addi %12, %11 : vector<16x16xi32>
    %c12_i32 = arith.constant 12 : i32
    %14 = vector.broadcast %c12_i32 : i32 to vector<16x16xi32>
    %15 = arith.cmpi slt, %13, %14 : vector<16x16xi32>
    %cst_9 = arith.constant -1.000000e+30 : f32
    %16 = vector.broadcast %cst_9 : f32 to vector<16x16xf32>
    %17 = arith.select %15, %9, %16 : vector<16x16xi1>, vector<16x16xf32>
    %c0_10 = arith.constant 0 : index
    %c0_11 = arith.constant 0 : index
    %18 = vector.load %arg7[%c0_10, %c0_11] : memref<16x1xf32, #tpu.memory_space<vmem>>, vector<16x1xf32>
    %cst_12 = arith.constant dense<0xFF800000> : vector<16xf32>
    %19 = vector.multi_reduction <maximumf>, %17, %cst_12 [1] : vector<16x16xf32> to vector<16xf32>
    %20 = vector.shape_cast %19 : vector<16xf32> to vector<16x1xf32>
    %21 = arith.maximumf %18, %20 : vector<16x1xf32>
    %22 = arith.subf %18, %21 : vector<16x1xf32>
    %23 = math.exp %22 : vector<16x1xf32>
    %24 = vector.broadcast %21 : vector<16x1xf32> to vector<16x16xf32>
    %25 = arith.subf %17, %24 : vector<16x16xf32>
    %26 = math.exp %25 : vector<16x16xf32>
    %c0_13 = arith.constant 0 : index
    %c0_14 = arith.constant 0 : index
    %27 = vector.load %arg8[%c0_13, %c0_14] : memref<16x1xf32, #tpu.memory_space<vmem>>, vector<16x1xf32>
    %28 = arith.mulf %23, %27 : vector<16x1xf32>
    %cst_15 = arith.constant dense<0.000000e+00> : vector<16xf32>
    %29 = vector.multi_reduction <add>, %26, %cst_15 [1] : vector<16x16xf32> to vector<16xf32>
    %30 = vector.shape_cast %29 : vector<16xf32> to vector<16x1xf32>
    %31 = arith.addf %28, %30 : vector<16x1xf32>
    %c0_16 = arith.constant 0 : index
    %c0_17 = arith.constant 0 : index
    %32 = vector.load %arg8[%c0_16, %c0_17] : memref<16x1xf32, #tpu.memory_space<vmem>>, vector<16x1xf32>
    tpu.vector_store %arg8[%c0_16, %c0_17], %31 {strides = array<i32>} : memref<16x1xf32, #tpu.memory_space<vmem>>, vector<16x1xf32>,
    %c0_18 = arith.constant 0 : index
    %c0_19 = arith.constant 0 : index
    %33 = vector.load %arg9[%c0_18, %c0_19] : memref<16x16xf32, #tpu.memory_space<vmem>>, vector<16x16xf32>
    %34 = vector.broadcast %23 : vector<16x1xf32> to vector<16x16xf32>
    %35 = arith.mulf %34, %33 : vector<16x16xf32>
    %36 = arith.truncf %26 : vector<16x16xf32> to vector<16x16xbf16>
    %cst_20 = arith.constant dense<0.000000e+00> : vector<16x16xf32>
    %37 = tpu.matmul %36, %8, %cst_20 {dimension_numbers = #tpu.dot_dimension_numbers<[1], [0], [0], [1], [0, 0, 1, 1], [], []>} : vector<16x16xbf16>, vector<16x16xbf16>, vector<16x16xf32> -> vector<16x16xf32>
    %38 = arith.addf %35, %37 : vector<16x16xf32>
    %c0_21 = arith.constant 0 : index
    %c0_22 = arith.constant 0 : index
    %39 = vector.load %arg9[%c0_21, %c0_22] : memref<16x16xf32, #tpu.memory_space<vmem>>, vector<16x16xf32>
    tpu.vector_store %arg9[%c0_21, %c0_22], %38 {strides = array<i32>} : memref<16x16xf32, #tpu.memory_space<vmem>>, vector<16x16xf32>,
    %c0_23 = arith.constant 0 : index
    %c0_24 = arith.constant 0 : index
    %40 = vector.load %arg7[%c0_23, %c0_24] : memref<16x1xf32, #tpu.memory_space<vmem>>, vector<16x1xf32>
    tpu.vector_store %arg7[%c0_23, %c0_24], %21 {strides = array<i32>} : memref<16x1xf32, #tpu.memory_space<vmem>>, vector<16x1xf32>,
    %c0_i32_25 = arith.constant 0 : i32
    %41 = arith.cmpi eq, %arg2, %c0_i32_25 : i32
    %42 = arith.extui %41 : i1 to i32
    %c0_i32_26 = arith.constant 0 : i32
    %43 = arith.cmpi ne, %42, %c0_i32_26 : i32
    scf.if %43 {
      %c0_27 = arith.constant 0 : index
      %c0_28 = arith.constant 0 : index
      %44 = vector.load %arg9[%c0_27, %c0_28] : memref<16x16xf32, #tpu.memory_space<vmem>>, vector<16x16xf32>
      %c0_29 = arith.constant 0 : index
      %c0_30 = arith.constant 0 : index
      %45 = vector.load %arg8[%c0_29, %c0_30] : memref<16x1xf32, #tpu.memory_space<vmem>>, vector<16x1xf32>
      %46 = tpu.reciprocal %45 : vector<16x1xf32> -> vector<16x1xf32>
      %47 = vector.broadcast %46 : vector<16x1xf32> to vector<16x16xf32>
      %48 = arith.mulf %44, %47 : vector<16x16xf32>
      %49 = arith.truncf %48 : vector<16x16xf32> to vector<16x16xbf16>
      %c0_31 = arith.constant 0 : index
      %c0_32 = arith.constant 0 : index
      %c0_33 = arith.constant 0 : index
      %50 = vector.load %arg6[%c0_31, %c0_32, %c0_33] : memref<1x16x16xbf16, #tpu.memory_space<vmem>>, vector<1x16x16xbf16>
      %51 = vector.shape_cast %50 : vector<1x16x16xbf16> to vector<16x16xbf16>
      %52 = vector.shape_cast %49 : vector<16x16xbf16> to vector<1x16x16xbf16>
      tpu.vector_store %arg6[%c0_31, %c0_32, %c0_33], %52 {strides = array<i32>} : memref<1x16x16xbf16, #tpu.memory_space<vmem>>, vector<1x16x16xbf16>,
    } else {
    }
    return
  }
  func.func @transform_0(%arg0: i32, %arg1: i32, %arg2: i32) -> (i32, i32, i32) {
    %c0_i32 = arith.constant 0 : i32
    %c0_i32_0 = arith.constant 0 : i32
    return %arg0, %arg1, %c0_i32 : i32, i32, i32
  }
  func.func @transform_1(%arg0: i32, %arg1: i32, %arg2: i32) -> (i32, i32, i32) {
    %c0_i32 = arith.constant 0 : i32
    %c0_i32_0 = arith.constant 0 : i32
    return %arg0, %arg2, %c0_i32 : i32, i32, i32
  }
  func.func @transform_2(%arg0: i32, %arg1: i32, %arg2: i32) -> (i32, i32, i32) {
    %c0_i32 = arith.constant 0 : i32
    %c0_i32_0 = arith.constant 0 : i32
    return %arg0, %arg2, %c0_i32 : i32, i32, i32
  }
  func.func @transform_3(%arg0: i32, %arg1: i32, %arg2: i32) -> (i32, i32, i32) {
    %c0_i32 = arith.constant 0 : i32
    %c0_i32_0 = arith.constant 0 : i32
    return %arg0, %arg1, %c0_i32 : i32, i32, i32
  }
}

module attributes {stable_mosaic.version = 11 : i64} {
  func.func @kernel(%arg0: i32, %arg1: i32, %arg2: i32, %arg3: memref<32x64xbf16, #tpu.memory_space<vmem>>, %arg4: memref<64x64xbf16, #tpu.memory_space<vmem>>, %arg5: memref<1x64xf32, #tpu.memory_space<vmem>>, %arg6: memref<32x64xbf16, #tpu.memory_space<vmem>>, %arg7: memref<32x64xbf16, #tpu.memory_space<vmem>>, %arg8: memref<32x64xf32, #tpu.memory_space<vmem>>) attributes {dimension_semantics = [#tpu.dimension_semantics<parallel>, #tpu.dimension_semantics<parallel>, #tpu.dimension_semantics<arbitrary>], iteration_bounds = array<i64: 1, 1, 1>, scalar_prefetch = 0 : i64, scratch_operands = 1 : i64, tpu.core_type = #tpu.core_type<tc>, window_params = [{transform_indices = @transform_0, window_bounds = array<i64: 32, 64>}, {transform_indices = @transform_1, window_bounds = array<i64: 64, 64>}, {transform_indices = @transform_2, window_bounds = array<i64: 1, 64>}, {transform_indices = @transform_3, window_bounds = array<i64: 32, 64>}, {transform_indices = @transform_4, window_bounds = array<i64: 32, 64>}]} {
    %c0_i32 = arith.constant 0 : i32
    %0 = arith.cmpi eq, %arg2, %c0_i32 : i32
    %1 = arith.extui %0 : i1 to i32
    %c0_i32_0 = arith.constant 0 : i32
    %2 = arith.cmpi ne, %1, %c0_i32_0 : i32
    scf.if %2 {
      %cst_10 = arith.constant 0.000000e+00 : f32
      %12 = vector.broadcast %cst_10 : f32 to vector<32x64xf32>
      %c0_11 = arith.constant 0 : index
      %c0_12 = arith.constant 0 : index
      %13 = vector.load %arg8[%c0_11, %c0_12] : memref<32x64xf32, #tpu.memory_space<vmem>>, vector<32x64xf32>
      tpu.vector_store %arg8[%c0_11, %c0_12], %12 {strides = array<i32>} : memref<32x64xf32, #tpu.memory_space<vmem>>, vector<32x64xf32>,
    } else {
    }
    %c0 = arith.constant 0 : index
    %c0_1 = arith.constant 0 : index
    %3 = vector.load %arg3[%c0, %c0_1] : memref<32x64xbf16, #tpu.memory_space<vmem>>, vector<32x64xbf16>
    %c0_2 = arith.constant 0 : index
    %c0_3 = arith.constant 0 : index
    %4 = vector.load %arg8[%c0_2, %c0_3] : memref<32x64xf32, #tpu.memory_space<vmem>>, vector<32x64xf32>
    %c0_4 = arith.constant 0 : index
    %c0_5 = arith.constant 0 : index
    %5 = vector.load %arg4[%c0_4, %c0_5] : memref<64x64xbf16, #tpu.memory_space<vmem>>, vector<64x64xbf16>
    %cst = arith.constant dense<0.000000e+00> : vector<32x64xf32>
    %6 = tpu.matmul %3, %5, %cst {dimension_numbers = #tpu.dot_dimension_numbers<[1], [0], [0], [1], [0, 0, 1, 1], [], []>} : vector<32x64xbf16>, vector<64x64xbf16>, vector<32x64xf32> -> vector<32x64xf32>
    %7 = arith.addf %4, %6 : vector<32x64xf32>
    %c0_6 = arith.constant 0 : index
    %c0_7 = arith.constant 0 : index
    %8 = vector.load %arg8[%c0_6, %c0_7] : memref<32x64xf32, #tpu.memory_space<vmem>>, vector<32x64xf32>
    tpu.vector_store %arg8[%c0_6, %c0_7], %7 {strides = array<i32>} : memref<32x64xf32, #tpu.memory_space<vmem>>, vector<32x64xf32>,
    %c0_i32_8 = arith.constant 0 : i32
    %9 = arith.cmpi eq, %arg2, %c0_i32_8 : i32
    %10 = arith.extui %9 : i1 to i32
    %c0_i32_9 = arith.constant 0 : i32
    %11 = arith.cmpi ne, %10, %c0_i32_9 : i32
    scf.if %11 {
      %c0_10 = arith.constant 0 : index
      %c0_11 = arith.constant 0 : index
      %12 = vector.load %arg8[%c0_10, %c0_11] : memref<32x64xf32, #tpu.memory_space<vmem>>, vector<32x64xf32>
      %c0_12 = arith.constant 0 : index
      %c0_13 = arith.constant 0 : index
      %13 = vector.load %arg5[%c0_12, %c0_13] : memref<1x64xf32, #tpu.memory_space<vmem>>, vector<1x64xf32>
      %14 = vector.broadcast %13 : vector<1x64xf32> to vector<32x64xf32>
      %15 = arith.addf %12, %14 : vector<32x64xf32>
      %c0_14 = arith.constant 0 : index
      %c0_15 = arith.constant 0 : index
      %16 = vector.load %arg6[%c0_14, %c0_15] : memref<32x64xbf16, #tpu.memory_space<vmem>>, vector<32x64xbf16>
      %17 = arith.extf %16 : vector<32x64xbf16> to vector<32x64xf32>
      %18 = arith.addf %15, %17 : vector<32x64xf32>
      %19 = arith.truncf %18 : vector<32x64xf32> to vector<32x64xbf16>
      %c0_16 = arith.constant 0 : index
      %c0_17 = arith.constant 0 : index
      %20 = vector.load %arg7[%c0_16, %c0_17] : memref<32x64xbf16, #tpu.memory_space<vmem>>, vector<32x64xbf16>
      tpu.vector_store %arg7[%c0_16, %c0_17], %19 {strides = array<i32>} : memref<32x64xbf16, #tpu.memory_space<vmem>>, vector<32x64xbf16>,
    } else {
    }
    return
  }
  func.func @transform_0(%arg0: i32, %arg1: i32, %arg2: i32) -> (i32, i32) {
    %c0_i32 = arith.constant 0 : i32
    return %arg0, %arg2 : i32, i32
  }
  func.func @transform_1(%arg0: i32, %arg1: i32, %arg2: i32) -> (i32, i32) {
    %c0_i32 = arith.constant 0 : i32
    return %arg2, %arg1 : i32, i32
  }
  func.func @transform_2(%arg0: i32, %arg1: i32, %arg2: i32) -> (i32, i32) {
    %c0_i32 = arith.constant 0 : i32
    %c0_i32_0 = arith.constant 0 : i32
    return %c0_i32, %arg1 : i32, i32
  }
  func.func @transform_3(%arg0: i32, %arg1: i32, %arg2: i32) -> (i32, i32) {
    %c0_i32 = arith.constant 0 : i32
    return %arg0, %arg1 : i32, i32
  }
  func.func @transform_4(%arg0: i32, %arg1: i32, %arg2: i32) -> (i32, i32) {
    %c0_i32 = arith.constant 0 : i32
    return %arg0, %arg1 : i32, i32
  }
}

module attributes {stable_mosaic.version = 11 : i64} {
  func.func @kernel(%arg0: i32, %arg1: i32, %arg2: i32, %arg3: memref<32x64xbf16, #tpu.memory_space<vmem>>, %arg4: memref<64x128xbf16, #tpu.memory_space<vmem>>, %arg5: memref<1x128xf32, #tpu.memory_space<vmem>>, %arg6: memref<1x64xf32, #tpu.memory_space<vmem>>, %arg7: memref<1x64xf32, #tpu.memory_space<vmem>>, %arg8: memref<32x128xbf16, #tpu.memory_space<vmem>>, %arg9: memref<32x128xf32, #tpu.memory_space<vmem>>, %arg10: memref<32x64xbf16, #tpu.memory_space<vmem>>) attributes {dimension_semantics = [#tpu.dimension_semantics<parallel>, #tpu.dimension_semantics<arbitrary>, #tpu.dimension_semantics<arbitrary>], iteration_bounds = array<i64: 1, 1, 1>, scalar_prefetch = 0 : i64, scratch_operands = 2 : i64, tpu.core_type = #tpu.core_type<tc>, window_params = [{transform_indices = @transform_0, window_bounds = array<i64: 32, 64>}, {transform_indices = @transform_1, window_bounds = array<i64: 64, 128>}, {transform_indices = @transform_2, window_bounds = array<i64: 1, 128>}, {transform_indices = @transform_3, window_bounds = array<i64: 1, 64>}, {transform_indices = @transform_4, window_bounds = array<i64: 1, 64>}, {transform_indices = @transform_5, window_bounds = array<i64: 32, 128>}]} {
    %c0_i32 = arith.constant 0 : i32
    %0 = arith.cmpi eq, %arg2, %c0_i32 : i32
    %1 = arith.extui %0 : i1 to i32
    %c0_i32_0 = arith.constant 0 : i32
    %2 = arith.cmpi ne, %1, %c0_i32_0 : i32
    scf.if %2 {
      %cst_12 = arith.constant 0.000000e+00 : f32
      %15 = vector.broadcast %cst_12 : f32 to vector<32x128xf32>
      %c0_13 = arith.constant 0 : index
      %c0_14 = arith.constant 0 : index
      %16 = vector.load %arg9[%c0_13, %c0_14] : memref<32x128xf32, #tpu.memory_space<vmem>>, vector<32x128xf32>
      tpu.vector_store %arg9[%c0_13, %c0_14], %15 {strides = array<i32>} : memref<32x128xf32, #tpu.memory_space<vmem>>, vector<32x128xf32>,
    } else {
    }
    %c0_i32_1 = arith.constant 0 : i32
    %3 = arith.cmpi eq, %arg1, %c0_i32_1 : i32
    %4 = arith.extui %3 : i1 to i32
    %c0_i32_2 = arith.constant 0 : i32
    %5 = arith.cmpi ne, %4, %c0_i32_2 : i32
    scf.if %5 {
      %c0_12 = arith.constant 0 : index
      %c0_13 = arith.constant 0 : index
      %15 = vector.load %arg3[%c0_12, %c0_13] : memref<32x64xbf16, #tpu.memory_space<vmem>>, vector<32x64xbf16>
      %16 = arith.extf %15 : vector<32x64xbf16> to vector<32x64xf32>
      %cst_14 = arith.constant dense<0.000000e+00> : vector<32xf32>
      %17 = vector.multi_reduction <add>, %16, %cst_14 [1] : vector<32x64xf32> to vector<32xf32>
      %18 = vector.shape_cast %17 : vector<32xf32> to vector<32x1xf32>
      %cst_15 = arith.constant 6.400000e+01 : f32
      %19 = vector.broadcast %cst_15 : f32 to vector<32x1xf32>
      %20 = arith.divf %18, %19 : vector<32x1xf32>
      %21 = vector.broadcast %20 : vector<32x1xf32> to vector<32x64xf32>
      %22 = arith.subf %16, %21 : vector<32x64xf32>
      %23 = arith.mulf %22, %22 : vector<32x64xf32>
      %cst_16 = arith.constant dense<0.000000e+00> : vector<32xf32>
      %24 = vector.multi_reduction <add>, %23, %cst_16 [1] : vector<32x64xf32> to vector<32xf32>
      %25 = vector.shape_cast %24 : vector<32xf32> to vector<32x1xf32>
      %cst_17 = arith.constant 6.400000e+01 : f32
      %26 = vector.broadcast %cst_17 : f32 to vector<32x1xf32>
      %27 = arith.divf %25, %26 : vector<32x1xf32>
      %cst_18 = arith.constant 9.99999974E-6 : f32
      %28 = vector.broadcast %cst_18 : f32 to vector<32x1xf32>
      %29 = arith.addf %27, %28 : vector<32x1xf32>
      %30 = math.rsqrt %29 : vector<32x1xf32>
      %31 = vector.broadcast %30 : vector<32x1xf32> to vector<32x64xf32>
      %32 = arith.mulf %22, %31 : vector<32x64xf32>
      %c0_19 = arith.constant 0 : index
      %c0_20 = arith.constant 0 : index
      %33 = vector.load %arg6[%c0_19, %c0_20] : memref<1x64xf32, #tpu.memory_space<vmem>>, vector<1x64xf32>
      %34 = vector.broadcast %33 : vector<1x64xf32> to vector<32x64xf32>
      %35 = arith.mulf %32, %34 : vector<32x64xf32>
      %c0_21 = arith.constant 0 : index
      %c0_22 = arith.constant 0 : index
      %36 = vector.load %arg7[%c0_21, %c0_22] : memref<1x64xf32, #tpu.memory_space<vmem>>, vector<1x64xf32>
      %37 = vector.broadcast %36 : vector<1x64xf32> to vector<32x64xf32>
      %38 = arith.addf %35, %37 : vector<32x64xf32>
      %39 = arith.truncf %38 : vector<32x64xf32> to vector<32x64xbf16>
      %c0_23 = arith.constant 0 : index
      %c0_24 = arith.constant 0 : index
      %40 = vector.load %arg10[%c0_23, %c0_24] : memref<32x64xbf16, #tpu.memory_space<vmem>>, vector<32x64xbf16>
      tpu.vector_store %arg10[%c0_23, %c0_24], %39 {strides = array<i32>} : memref<32x64xbf16, #tpu.memory_space<vmem>>, vector<32x64xbf16>,
    } else {
    }
    %c0 = arith.constant 0 : index
    %c0_3 = arith.constant 0 : index
    %6 = vector.load %arg10[%c0, %c0_3] : memref<32x64xbf16, #tpu.memory_space<vmem>>, vector<32x64xbf16>
    %c0_4 = arith.constant 0 : index
    %c0_5 = arith.constant 0 : index
    %7 = vector.load %arg9[%c0_4, %c0_5] : memref<32x128xf32, #tpu.memory_space<vmem>>, vector<32x128xf32>
    %c0_6 = arith.constant 0 : index
    %c0_7 = arith.constant 0 : index
    %8 = vector.load %arg4[%c0_6, %c0_7] : memref<64x128xbf16, #tpu.memory_space<vmem>>, vector<64x128xbf16>
    %cst = arith.constant dense<0.000000e+00> : vector<32x128xf32>
    %9 = tpu.matmul %6, %8, %cst {dimension_numbers = #tpu.dot_dimension_numbers<[1], [0], [0], [1], [0, 0, 1, 1], [], []>} : vector<32x64xbf16>, vector<64x128xbf16>, vector<32x128xf32> -> vector<32x128xf32>
    %10 = arith.addf %7, %9 : vector<32x128xf32>
    %c0_8 = arith.constant 0 : index
    %c0_9 = arith.constant 0 : index
    %11 = vector.load %arg9[%c0_8, %c0_9] : memref<32x128xf32, #tpu.memory_space<vmem>>, vector<32x128xf32>
    tpu.vector_store %arg9[%c0_8, %c0_9], %10 {strides = array<i32>} : memref<32x128xf32, #tpu.memory_space<vmem>>, vector<32x128xf32>,
    %c0_i32_10 = arith.constant 0 : i32
    %12 = arith.cmpi eq, %arg2, %c0_i32_10 : i32
    %13 = arith.extui %12 : i1 to i32
    %c0_i32_11 = arith.constant 0 : i32
    %14 = arith.cmpi ne, %13, %c0_i32_11 : i32
    scf.if %14 {
      %c0_12 = arith.constant 0 : index
      %c0_13 = arith.constant 0 : index
      %15 = vector.load %arg9[%c0_12, %c0_13] : memref<32x128xf32, #tpu.memory_space<vmem>>, vector<32x128xf32>
      %c0_14 = arith.constant 0 : index
      %c0_15 = arith.constant 0 : index
      %16 = vector.load %arg5[%c0_14, %c0_15] : memref<1x128xf32, #tpu.memory_space<vmem>>, vector<1x128xf32>
      %17 = vector.broadcast %16 : vector<1x128xf32> to vector<32x128xf32>
      %18 = arith.addf %15, %17 : vector<32x128xf32>
      %19 = arith.mulf %18, %18 : vector<32x128xf32>
      %20 = arith.mulf %18, %19 : vector<32x128xf32>
      %cst_16 = arith.constant 4.471500e-02 : f32
      %21 = vector.broadcast %cst_16 : f32 to vector<32x128xf32>
      %22 = arith.mulf %21, %20 : vector<32x128xf32>
      %23 = arith.addf %18, %22 : vector<32x128xf32>
      %cst_17 = arith.constant 0.797884583 : f32
      %24 = vector.broadcast %cst_17 : f32 to vector<32x128xf32>
      %25 = arith.mulf %24, %23 : vector<32x128xf32>
      %26 = math.tanh %25 : vector<32x128xf32>
      %cst_18 = arith.constant 1.000000e+00 : f32
      %27 = vector.broadcast %cst_18 : f32 to vector<32x128xf32>
      %28 = arith.addf %27, %26 : vector<32x128xf32>
      %cst_19 = arith.constant 5.000000e-01 : f32
      %29 = vector.broadcast %cst_19 : f32 to vector<32x128xf32>
      %30 = arith.mulf %29, %28 : vector<32x128xf32>
      %31 = arith.mulf %18, %30 : vector<32x128xf32>
      %32 = arith.truncf %31 : vector<32x128xf32> to vector<32x128xbf16>
      %c0_20 = arith.constant 0 : index
      %c0_21 = arith.constant 0 : index
      %33 = vector.load %arg8[%c0_20, %c0_21] : memref<32x128xbf16, #tpu.memory_space<vmem>>, vector<32x128xbf16>
      tpu.vector_store %arg8[%c0_20, %c0_21], %32 {strides = array<i32>} : memref<32x128xbf16, #tpu.memory_space<vmem>>, vector<32x128xbf16>,
    } else {
    }
    return
  }
  func.func @transform_0(%arg0: i32, %arg1: i32, %arg2: i32) -> (i32, i32) {
    %c0_i32 = arith.constant 0 : i32
    return %arg0, %arg2 : i32, i32
  }
  func.func @transform_1(%arg0: i32, %arg1: i32, %arg2: i32) -> (i32, i32) {
    %c0_i32 = arith.constant 0 : i32
    return %arg2, %arg1 : i32, i32
  }
  func.func @transform_2(%arg0: i32, %arg1: i32, %arg2: i32) -> (i32, i32) {
    %c0_i32 = arith.constant 0 : i32
    %c0_i32_0 = arith.constant 0 : i32
    return %c0_i32, %arg1 : i32, i32
  }
  func.func @transform_3(%arg0: i32, %arg1: i32, %arg2: i32) -> (i32, i32) {
    %c0_i32 = arith.constant 0 : i32
    %c0_i32_0 = arith.constant 0 : i32
    return %c0_i32, %arg2 : i32, i32
  }
  func.func @transform_4(%arg0: i32, %arg1: i32, %arg2: i32) -> (i32, i32) {
    %c0_i32 = arith.constant 0 : i32
    %c0_i32_0 = arith.constant 0 : i32
    return %c0_i32, %arg2 : i32, i32
  }
  func.func @transform_5(%arg0: i32, %arg1: i32, %arg2: i32) -> (i32, i32) {
    %c0_i32 = arith.constant 0 : i32
    return %arg0, %arg1 : i32, i32
  }
}

module attributes {stable_mosaic.version = 11 : i64} {
  func.func @kernel(%arg0: i32, %arg1: i32, %arg2: i32, %arg3: memref<32x128xbf16, #tpu.memory_space<vmem>>, %arg4: memref<128x64xbf16, #tpu.memory_space<vmem>>, %arg5: memref<1x64xf32, #tpu.memory_space<vmem>>, %arg6: memref<32x64xbf16, #tpu.memory_space<vmem>>, %arg7: memref<32x64xf32, #tpu.memory_space<vmem>>, %arg8: memref<32x64xf32, #tpu.memory_space<vmem>>) attributes {dimension_semantics = [#tpu.dimension_semantics<parallel>, #tpu.dimension_semantics<parallel>, #tpu.dimension_semantics<arbitrary>], iteration_bounds = array<i64: 1, 1, 1>, scalar_prefetch = 0 : i64, scratch_operands = 1 : i64, tpu.core_type = #tpu.core_type<tc>, window_params = [{transform_indices = @transform_0, window_bounds = array<i64: 32, 128>}, {transform_indices = @transform_1, window_bounds = array<i64: 128, 64>}, {transform_indices = @transform_2, window_bounds = array<i64: 1, 64>}, {transform_indices = @transform_3, window_bounds = array<i64: 32, 64>}, {transform_indices = @transform_4, window_bounds = array<i64: 32, 64>}]} {
    %c0_i32 = arith.constant 0 : i32
    %0 = arith.cmpi eq, %arg2, %c0_i32 : i32
    %1 = arith.extui %0 : i1 to i32
    %c0_i32_0 = arith.constant 0 : i32
    %2 = arith.cmpi ne, %1, %c0_i32_0 : i32
    scf.if %2 {
      %cst_10 = arith.constant 0.000000e+00 : f32
      %12 = vector.broadcast %cst_10 : f32 to vector<32x64xf32>
      %c0_11 = arith.constant 0 : index
      %c0_12 = arith.constant 0 : index
      %13 = vector.load %arg8[%c0_11, %c0_12] : memref<32x64xf32, #tpu.memory_space<vmem>>, vector<32x64xf32>
      tpu.vector_store %arg8[%c0_11, %c0_12], %12 {strides = array<i32>} : memref<32x64xf32, #tpu.memory_space<vmem>>, vector<32x64xf32>,
    } else {
    }
    %c0 = arith.constant 0 : index
    %c0_1 = arith.constant 0 : index
    %3 = vector.load %arg3[%c0, %c0_1] : memref<32x128xbf16, #tpu.memory_space<vmem>>, vector<32x128xbf16>
    %c0_2 = arith.constant 0 : index
    %c0_3 = arith.constant 0 : index
    %4 = vector.load %arg8[%c0_2, %c0_3] : memref<32x64xf32, #tpu.memory_space<vmem>>, vector<32x64xf32>
    %c0_4 = arith.constant 0 : index
    %c0_5 = arith.constant 0 : index
    %5 = vector.load %arg4[%c0_4, %c0_5] : memref<128x64xbf16, #tpu.memory_space<vmem>>, vector<128x64xbf16>
    %cst = arith.constant dense<0.000000e+00> : vector<32x64xf32>
    %6 = tpu.matmul %3, %5, %cst {dimension_numbers = #tpu.dot_dimension_numbers<[1], [0], [0], [1], [0, 0, 1, 1], [], []>} : vector<32x128xbf16>, vector<128x64xbf16>, vector<32x64xf32> -> vector<32x64xf32>
    %7 = arith.addf %4, %6 : vector<32x64xf32>
    %c0_6 = arith.constant 0 : index
    %c0_7 = arith.constant 0 : index
    %8 = vector.load %arg8[%c0_6, %c0_7] : memref<32x64xf32, #tpu.memory_space<vmem>>, vector<32x64xf32>
    tpu.vector_store %arg8[%c0_6, %c0_7], %7 {strides = array<i32>} : memref<32x64xf32, #tpu.memory_space<vmem>>, vector<32x64xf32>,
    %c0_i32_8 = arith.constant 0 : i32
    %9 = arith.cmpi eq, %arg2, %c0_i32_8 : i32
    %10 = arith.extui %9 : i1 to i32
    %c0_i32_9 = arith.constant 0 : i32
    %11 = arith.cmpi ne, %10, %c0_i32_9 : i32
    scf.if %11 {
      %c0_10 = arith.constant 0 : index
      %c0_11 = arith.constant 0 : index
      %12 = vector.load %arg8[%c0_10, %c0_11] : memref<32x64xf32, #tpu.memory_space<vmem>>, vector<32x64xf32>
      %c0_12 = arith.constant 0 : index
      %c0_13 = arith.constant 0 : index
      %13 = vector.load %arg5[%c0_12, %c0_13] : memref<1x64xf32, #tpu.memory_space<vmem>>, vector<1x64xf32>
      %14 = vector.broadcast %13 : vector<1x64xf32> to vector<32x64xf32>
      %15 = arith.addf %12, %14 : vector<32x64xf32>
      %c0_14 = arith.constant 0 : index
      %c0_15 = arith.constant 0 : index
      %16 = vector.load %arg6[%c0_14, %c0_15] : memref<32x64xbf16, #tpu.memory_space<vmem>>, vector<32x64xbf16>
      %17 = arith.extf %16 : vector<32x64xbf16> to vector<32x64xf32>
      %18 = arith.addf %15, %17 : vector<32x64xf32>
      %c0_16 = arith.constant 0 : index
      %c0_17 = arith.constant 0 : index
      %19 = vector.load %arg7[%c0_16, %c0_17] : memref<32x64xf32, #tpu.memory_space<vmem>>, vector<32x64xf32>
      tpu.vector_store %arg7[%c0_16, %c0_17], %18 {strides = array<i32>} : memref<32x64xf32, #tpu.memory_space<vmem>>, vector<32x64xf32>,
    } else {
    }
    return
  }
  func.func @transform_0(%arg0: i32, %arg1: i32, %arg2: i32) -> (i32, i32) {
    %c0_i32 = arith.constant 0 : i32
    return %arg0, %arg2 : i32, i32
  }
  func.func @transform_1(%arg0: i32, %arg1: i32, %arg2: i32) -> (i32, i32) {
    %c0_i32 = arith.constant 0 : i32
    return %arg2, %arg1 : i32, i32
  }
  func.func @transform_2(%arg0: i32, %arg1: i32, %arg2: i32) -> (i32, i32) {
    %c0_i32 = arith.constant 0 : i32
    %c0_i32_0 = arith.constant 0 : i32
    return %c0_i32, %arg1 : i32, i32
  }
  func.func @transform_3(%arg0: i32, %arg1: i32, %arg2: i32) -> (i32, i32) {
    %c0_i32 = arith.constant 0 : i32
    return %arg0, %arg1 : i32, i32
  }
  func.func @transform_4(%arg0: i32, %arg1: i32, %arg2: i32) -> (i32, i32) {
    %c0_i32 = arith.constant 0 : i32
    return %arg0, %arg1 : i32, i32
  }
}

</mosaic_0001>

<bundles_post_ra>
// kernel: whisper_encoder_layer.5
= control target key start
LH: loop header
LB: loop body
LE: loop exit
PB: predicated region body
PF: predicated region fallthrough
CT: control target
= control target key end

     0   :  { %vm26_vm0 = vcmask 523264   ;;  %v426_v38 = vmov 0   ;;  %v427_v39 = vmov 0.0   ;;  %vm138_vm1 = vcmask 519168   ;;  %s563_s0 = inlined_call_operand.vmem [shape: bf16[32,64], index: 0, kind: input, shape index: {}]   ;;  %s564_s1 = inlined_call_operand.vmem [shape: bf16[64,192], index: 1, kind: input, shape index: {}]   ;;  %s565_s3 = inlined_call_operand.vmem [shape: f32[1,64], index: 3, kind: input, shape index: {}]   ;;  %s566_s4 = inlined_call_operand.vmem [shape: f32[1,64], index: 4, kind: input, shape index: {}]   ;;  %s567_s2 = inlined_call_operand.vmem [shape: f32[1,192], index: 2, kind: input, shape index: {}]   ;;  %s568_s5 = inlined_call_operand.vmem [shape: bf16[32,192], index: 5, kind: output, shape index: {}]  }
   0x1   :  { %v386_v0 = vld [vmem:[%s563_s0] sm:$0xff]   ;;  %v393_v1 = vld [vmem:[%s563_s0 + $0x8] sm:$0xff]   ;;  %v404_v30 = vld [vmem:[%s564_s1 + $0x34] ss:$8 sps:$4 sm:$0xff]   ;;  %252 = vmatprep.mubr.bf16.mxu0 %v426_v38  ;;  %262 = vmatprep.mubr.bf16.mxu1 %v426_v38  ;;  %27 = vst.msk [vmem:[#allocation2 + $0x8] sm:$0xff] %vm26_vm0, %v427_v39  ;;  %vm344_vm2 = vcmask 1043456  }
   0x2   :  { %v387_v2 = vunpack.c.l.bf16 %v386_v0  ;;  %v391_v3 = vunpack.c.l.bf16 %v393_v1  ;;  %v388_v4 = vunpack.c.h.bf16 %v386_v0  ;;  %v392_v5 = vunpack.c.h.bf16 %v393_v1  ;;  %v406_v31 = vld [vmem:[%s564_s1 + $0x30] ss:$8 sps:$4 sm:$0xff]   ;;  %228 = vmatprep.subr.bf16.mxu0 %v404_v30  ;;  %394 = vmatprep.subr.bf16.mxu1 %v404_v30  ;;  %v407_v32 = vld [vmem:[%s564_s1 + $0x24] ss:$8 sps:$4 sm:$0xff]   ;;  %v409_v33 = vld [vmem:[%s564_s1 + $0x20] ss:$8 sps:$4 sm:$0xff]  }
   0x3   :  { %229 = vmatpush1.bf16.msra.mxu0 %v406_v31  ;;  %398 = vmatpush1.bf16.msra.mxu1 %v406_v31  ;;  %v410_v34 = vld [vmem:[%s564_s1 + $0x14] ss:$8 sps:$4 sm:$0xff]   ;;  %v412_v35 = vld [vmem:[%s564_s1 + $0x10] ss:$8 sps:$4 sm:$0xff]   ;;  %v413_v36 = vld [vmem:[%s564_s1 + $0x4] ss:$8 sps:$4 sm:$0xff]  }
   0x4   :  { %v47_v6 = vsel %vm26_vm0, %v387_v2, 0.0  ;;  %v53_v7 = vsel %vm26_vm0, %v391_v3, 0.0  ;;  %v50_v8 = vsel %vm26_vm0, %v388_v4, 0.0  ;;  %v56_v9 = vsel %vm26_vm0, %v392_v5, 0.0  ;;  %230 = vmatprep.subr.bf16.mxu0 %v407_v32  ;;  %395 = vmatprep.subr.bf16.mxu1 %v407_v32  ;;  %v415_v37 = vld [vmem:[%s564_s1] ss:$8 sps:$4 sm:$0xff]  }
   0x5   :  { %48 = vadd.xlane.f32.xlu0 %v47_v6  ;;  %54 = vadd.xlane.f32.xlu1 %v53_v7  ;;  %29 = vst.msk [vmem:[#allocation2 + $0x18] sm:$0xff] %vm26_vm0, %v427_v39  ;;  %31 = vst.msk [vmem:[#allocation2 + $0x28] sm:$0xff] %vm26_vm0, %v427_v39  ;;  %v355_v53 = vld [vmem:[%s565_s3] ss:$0 sm:$0xff]  ;;  %vm345_vm3 = vcmask 523268  }
   0x6   :  { %33 = vst.msk [vmem:[#allocation2 + $0x38] sm:$0xff] %vm26_vm0, %v427_v39  ;;  %v356_v55 = vld [vmem:[%s566_s4] ss:$0 sm:$0xff]  ;;  %vm539_vm4 = vmor %vm345_vm3, %vm344_vm2 }
   0x7   :  { %231 = vmatpush1.bf16.msra.mxu0 %v409_v33  ;;  %399 = vmatpush1.bf16.msra.mxu1 %v409_v33 }
   0x8   :  { %232 = vmatprep.subr.bf16.mxu0 %v410_v34  ;;  %396 = vmatprep.subr.bf16.mxu1 %v410_v34 }
   0x9   :  { %51 = vadd.xlane.f32.xlu0 %v50_v8  ;;  %57 = vadd.xlane.f32.xlu1 %v56_v9 }
   0xb   :  { %233 = vmatpush1.bf16.msra.mxu0 %v412_v35  ;;  %400 = vmatpush1.bf16.msra.mxu1 %v412_v35 }
   0xc   :  { %234 = vmatprep.subr.bf16.mxu0 %v413_v36  ;;  %397 = vmatprep.subr.bf16.mxu1 %v413_v36 }
   0xd   :  { %v154_v30 = vld [vmem:[#allocation2 + $0x38] sm:$0xff] }
   0xf   :  { %235 = vmatpush1.bf16.msra.mxu0 %v415_v37  ;;  %401 = vmatpush1.bf16.msra.mxu1 %v415_v37 }
  0x8e   :  { %v49_v10 = vpop.xlane.xlu0 %48  ;;  %v55_v11 = vpop.xlane.xlu1 %54 }
  0x8f   :  { %v60_v12 = vmul.f32 0.015625, %v49_v10  ;;  %v62_v13 = vmul.f32 0.015625, %v55_v11 }
  0x91   :  { %v468_v14 = vsub.f32 %v387_v2, %v60_v12  ;;  %v470_v15 = vsub.f32 %v391_v3, %v62_v13  ;;  %v302_v12 = vlaneseq }
  0x92   :  { %v52_v16 = vpop.xlane.xlu0 %51  ;;  %v58_v17 = vpop.xlane.xlu1 %57 }
  0x93   :  { %v61_v18 = vmul.f32 0.015625, %v52_v16  ;;  %v63_v19 = vmul.f32 0.015625, %v58_v17  ;;  %v68_v20 = vmul.f32 %v468_v14, %v468_v14  ;;  %v70_v21 = vmul.f32 %v470_v15, %v470_v15 }
  0x95   :  { %v476_v22 = vsub.f32 %v388_v4, %v61_v18  ;;  %v478_v23 = vsub.f32 %v392_v5, %v63_v19  ;;  %v72_v24 = vsel %vm26_vm0, %v68_v20, 0.0  ;;  %v78_v25 = vsel %vm26_vm0, %v70_v21, 0.0  ;;  %v150_v20 = vld [vmem:[#allocation2 + $0x18] sm:$0xff]  ;;  %v152_v21 = vld [vmem:[#allocation2 + $0x28] sm:$0xff] }
  0x96   :  { %73 = vadd.xlane.f32.xlu0 %v72_v24  ;;  %v300_v24 = vld [vmem:[%s567_s2] sm:$0x3] }
  0x97   :  { %v69_v26 = vmul.f32 %v476_v22, %v476_v22  ;;  %v71_v27 = vmul.f32 %v478_v23, %v478_v23 }
  0x99   :  { %v75_v28 = vsel %vm26_vm0, %v69_v26, 0.0  ;;  %v81_v29 = vsel %vm26_vm0, %v71_v27, 0.0 }
  0x9a   :  { %79 = vadd.xlane.f32.xlu0 %v78_v25  ;;  %76 = vadd.xlane.f32.xlu1 %v75_v28 }
  0x9e   :  { %82 = vadd.xlane.f32.xlu1 %v81_v29 }
 0x11f   :  { %v74_v40 = vpop.xlane.xlu0 %73 }
 0x120   :  { %v84_v41 = vmul.f32 0.015625, %v74_v40 }
 0x122   :  { %v88_v42 = vadd.f32 1e-05, %v84_v41 }
 0x123   :  { %v77_v43 = vpop.xlane.xlu1 %76  ;;  %v80_v44 = vpop.xlane.xlu0 %79 }
 0x124   :  { %418 = vrsqrt.f32 %v88_v42  ;;  %v85_v45 = vmul.f32 0.015625, %v77_v43  ;;  %v86_v46 = vmul.f32 0.015625, %v80_v44 }
 0x126   :  { %v89_v47 = vadd.f32 1e-05, %v85_v45  ;;  %v90_v48 = vadd.f32 1e-05, %v86_v46 }
 0x127   :  { %v83_v49 = vpop.xlane.xlu1 %82 }
 0x128   :  { %420 = vrsqrt.f32 %v89_v47  ;;  %v87_v50 = vmul.f32 0.015625, %v83_v49 }
 0x129   :  { %422 = vrsqrt.f32 %v90_v48 }
 0x12a   :  { %v91_v51 = vadd.f32 1e-05, %v87_v50 }
 0x12c   :  { %424 = vrsqrt.f32 %v91_v51 }
 0x131   :  { %v419_v52 = vpop.eup %418 }
 0x132   :  { %v96_v54 = vmul.f32 %v419_v52, %v468_v14  ;;  %v148_v14 = vld [vmem:[#allocation2 + $0x8] sm:$0xff] }
 0x134   :  { %v107_v56 = vmul.f32 %v355_v53, %v96_v54 }
 0x135   :  { %v421_v57 = vpop.eup %420 }
 0x136   :  { %v423_v58 = vpop.eup %422  ;;  %v118_v59 = vadd.f32 %v356_v55, %v107_v56  ;;  %v97_v60 = vmul.f32 %v421_v57, %v476_v22 }
 0x137   :  { %v98_v61 = vmul.f32 %v423_v58, %v470_v15  ;;  %v303_v15 = vshrl.u32 %v302_v12, 7 }
 0x138   :  { %v377_v62 = vpack.c.bf16 %v118_v59, %v118_v59  ;;  %v108_v63 = vmul.f32 %v355_v53, %v97_v60 }
 0x139   :  { %v425_v0 = vpop.eup %424  ;;  %v109_v1 = vmul.f32 %v355_v53, %v98_v61  ;;  %v304_v22 = vsub.s32 0, %v303_v15 }
 0x13a   :  { %139 = vst.msk [vmem:[#allocation3] sm:$0xf] %vm138_vm1, %v377_v62  ;;  %v119_v2 = vadd.f32 %v356_v55, %v108_v63  ;;  %v99_v3 = vmul.f32 %v425_v0, %v478_v23  ;;  %v308_v23 = vsub.s32 1, %v303_v15 }
 0x13b   :  { %v120_v4 = vadd.f32 %v356_v55, %v109_v1  ;;  %v305_v31 = vrot.slane %v300_v24, %v304_v22 }
 0x13c   :  { %v378_v5 = vpack.c.bf16 %v119_v2, %v119_v2  ;;  %v110_v6 = vmul.f32 %v355_v53, %v99_v3  ;;  %v309_v32 = vrot.slane %v300_v24, %v308_v23 }
 0x13d   :  { %v379_v7 = vpack.c.bf16 %v120_v4, %v120_v4 }
 0x13e   :  { %140 = vst.msk [vmem:[#allocation3 + $0x4] sm:$0xf] %vm138_vm1, %v378_v5  ;;  %v121_v8 = vadd.f32 %v356_v55, %v110_v6 }
 0x13f   :  { %141 = vst.msk [vmem:[#allocation3 + $0x8] sm:$0xf] %vm138_vm1, %v379_v7 }
 0x140   :  { %v380_v9 = vpack.c.bf16 %v121_v8, %v121_v8 }
 0x142   :  { %142 = vst.msk [vmem:[#allocation3 + $0xc] sm:$0xf] %vm138_vm1, %v380_v9 }
 0x145   :  { %v416_v10 = vld [vmem:[#allocation3] sm:$0xff]  }
 0x146   :  { %371 = vmatmul.mubr.msk.bf16.vlgmr.msra.gmra.mxu0 %vm26_vm0, %v416_v10 }
 0x149   :  { %v417_v11 = vld [vmem:[#allocation3 + $0x8] sm:$0xff]  }
 0x14a   :  { %372 = vmatmul.mubr.msk.bf16.vlgmr.msra.gmra.mxu1 %vm26_vm0, %v417_v11 }
 0x206   :  { %v254_v13 = vpop.f32.mrf.mxu0 }
 0x207   :  { %v312_v36 = vadd.f32 %v305_v31, %v254_v13 }
 0x208   :  { %v256_v16 = vpop.f32.mrf.mxu0 }
 0x209   :  { %v274_v17 = vadd.f32 %v256_v16, %v148_v14 }
 0x20a   :  { %v258_v18 = vpop.f32.mrf.mxu0  ;;  %v264_v19 = vpop.f32.mrf.mxu1 }
 0x20b   :  { %282 = vst.msk [vmem:[#allocation2 + $0x8] sm:$0xff] %vm26_vm0, %v274_v17  ;;  %v314_v42 = vadd.f32 %v305_v31, %v258_v18  ;;  %v316_v43 = vadd.f32 %v305_v31, %v264_v19 }
 0x20c   :  { %v260_v25 = vpop.f32.mrf.mxu0  ;;  %v266_v26 = vpop.f32.mrf.mxu1 }
 0x20d   :  { %v276_v27 = vadd.f32 %v260_v25, %v150_v20  ;;  %v278_v28 = vadd.f32 %v266_v26, %v152_v21 }
 0x20e   :  { %v268_v29 = vpop.f32.mrf.mxu1 }
 0x20f   :  { %284 = vst.msk [vmem:[#allocation2 + $0x18] sm:$0xff] %vm26_vm0, %v276_v27  ;;  %286 = vst.msk [vmem:[#allocation2 + $0x28] sm:$0xff] %vm26_vm0, %v278_v28  ;;  %v318_v49 = vadd.f32 %v305_v31, %v268_v29 }
 0x210   :  { %v270_v33 = vpop.f32.mrf.mxu1 }
 0x211   :  { %v280_v34 = vadd.f32 %v270_v33, %v154_v30 }
 0x212   :  { %v293_v35 = vld [vmem:[#allocation2 + $0x8] sm:$0xff] }
 0x213   :  { %v313_v37 = vadd.f32 %v309_v32, %v293_v35  ;;  %288 = vst.msk [vmem:[#allocation2 + $0x38] sm:$0xff] %vm26_vm0, %v280_v34 }
 0x215   :  { %v381_v39 = vpack.c.bf16 %v313_v37, %v312_v36 }
 0x216   :  { %v295_v40 = vld [vmem:[#allocation2 + $0x18] sm:$0xff]  ;;  %v297_v41 = vld [vmem:[#allocation2 + $0x28] sm:$0xff] }
 0x217   :  { %347 = vst.msk [vmem:[%s568_s5] sm:$0xff] %vm539_vm4, %v381_v39  ;;  %v315_v44 = vadd.f32 %v309_v32, %v295_v40  ;;  %v317_v45 = vadd.f32 %v309_v32, %v297_v41 }
 0x219   :  { %v382_v46 = vpack.c.bf16 %v315_v44, %v314_v42  ;;  %v383_v47 = vpack.c.bf16 %v317_v45, %v316_v43 }
 0x21a   :  { %v299_v48 = vld [vmem:[#allocation2 + $0x38] sm:$0xff] }
 0x21b   :  { %348 = vst.msk [vmem:[%s568_s5 + $0x8] sm:$0xff] %vm539_vm4, %v382_v46  ;;  %349 = vst.msk [vmem:[%s568_s5 + $0x10] sm:$0xff] %vm539_vm4, %v383_v47  ;;  %v319_v50 = vadd.f32 %v309_v32, %v299_v48 }
 0x21d   :  { %v384_v51 = vpack.c.bf16 %v319_v50, %v318_v49 }
 0x21f   :  { %350 = vst.msk [vmem:[%s568_s5 + $0x18] sm:$0xff] %vm539_vm4, %v384_v51 }

// kernel: whisper_encoder_layer.6
= control target key start
LH: loop header
LB: loop body
LE: loop exit
PB: predicated region body
PF: predicated region fallthrough
CT: control target
= control target key end

     0   :  { %s787_s12 = smov 0   ;;  %s789_s13 = smov 0   ;;  %s851_s0 = inlined_call_operand.vmem [shape: bf16[8,16,16], index: 0, kind: input, shape index: {}]   ;;  %s852_s1 = inlined_call_operand.vmem [shape: bf16[8,16,16], index: 1, kind: input, shape index: {}]   ;;  %s853_s2 = inlined_call_operand.vmem [shape: bf16[8,16,16], index: 2, kind: input, shape index: {}]   ;;  %s854_s3 = inlined_call_operand.vmem [shape: bf16[8,16,16], index: 3, kind: output, shape index: {}]  }
   0x1   :  { %s791_s14 = smov 0  }
   0x2 LB: > { %s32_s15 = sadd.s32 1, %s757_s13  ;;  %p654_p0 = scmp.ge.s32.totalorder %s761_s14, 1  ;;  %s761_s14 = sphi %s791_s14, %s13_s14   ;;  %s757_s13 = sphi %s789_s13, %s856_s13   ;;  %s753_s12 = sphi %s787_s12, %s855_s12  }
   0x3   : > { %p34_p1 = scmp.ge.s32.totalorder %s32_s15, 8  ;;  %p199_p2 = scmp.lt.s32.totalorder %s761_s14, 9 }
   0x5   : > { %s858_s15 = smov (%p34_p1, %s32_s15), 0  ;;  %p200_p3 = pnand %p654_p0, %p199_p2 }
   0x6   : > { %p250_p4 = scmp.lt.s32.totalorder (!%p200_p3), %s753_s12, 7 }
   0x7   : > { %203 = sbr.rel (%p200_p3) target bundleno = 797 (0x31d), region = 32 }
   0xc   : > { %vm299_vm0 = vcmask 130048   ;;  %v763_v0 = vmov 0.0   ;;  %vm764_vm1 = vmmov 0   ;;  %s860_s12 = smov (!%p250_p4, %s753_s12), 7  ;;  %vm294_vm2 = vcmask 7168  }
   0xd   : > { %682 = vmatprep.subr.bf16.mxu0 %v763_v0  ;;  %300 = vst.msk [vmem:[#allocation4] sm:$0xff] %vm299_vm0, %v763_v0  ;;  %301 = vst.msk [vmem:[#allocation4 + $0x8] sm:$0xff] %vm299_vm0, %v763_v0  ;;  %684 = vmatprep.mubr.msk.bf16.mxu0 %vm764_vm1, %v763_v0  ;;  %s807_s16 = sshll.u32 %s860_s12, 3  ;;  %v765_v4 = vmov -inf   ;;  %v367_v5 = vlaneseq  ;;  %v766_v15 = vmov 0   ;;  %vm521_vm4 = vcmask 125952  }
   0xe   : > { %688 = vmatprep.subr.bf16.mxu1 %v763_v0  ;;  %690 = vmatprep.mubr.msk.bf16.mxu1 %vm764_vm1, %v763_v0  ;;  %s267_s19 = scalar_lea.vmem %s852_s1, %s807_s16  ;;  %s257_s22 = scalar_lea.vmem %s851_s0, %s807_s16  ;;  %295 = vst.msk [vmem:[#allocation2] sm:$0xff] %vm294_vm2, %v765_v4  ;;  %296 = vst.msk [vmem:[#allocation2 + $0x8] sm:$0xff] %vm294_vm2, %v765_v4 }
   0xf   : > { %v724_v1 = vld [vmem:[%s267_s19] sm:$0xff]   ;;  %297 = vst.msk [vmem:[#allocation3] sm:$0xff] %vm294_vm2, %v763_v0  ;;  %298 = vst.msk [vmem:[#allocation3 + $0x8] sm:$0xff] %vm294_vm2, %v763_v0  ;;  %v368_v6 = vand.u32 127, %v367_v5  ;;  %722 = vset.pattern.permute.xlu1 %v766_v15  ;;  %723 = vset.pattern.permute.xlu0 %v766_v15  ;;  %s277_s25 = scalar_lea.vmem %s853_s2, %s807_s16  ;;  %s287_s28 = scalar_lea.vmem %s854_s3, %s807_s16 }
  0x10   : > { %v323_v2 = vsel %vm299_vm0, %v724_v1, 0  ;;  %v725_v3 = vld [vmem:[%s257_s22] sm:$0xff]  }
  0x11   : > { %683 = vmatpush3.bf16.xpose.msra.mxu0 %v323_v2  ;;  %vm371_vm3 = vcmp.lt.s32.totalorder %v368_v6, 12  ;;  %v726_v24 = vld [vmem:[%s277_s25] sm:$0xff]  }
  0x12   : > { %689 = vmatpush3.bf16.msra.mxu1 %v726_v24 }
  0x14   : > { %v421_v52 = vld [vmem:[#allocation4] sm:$0xff]  ;;  %v422_v55 = vld [vmem:[#allocation4 + $0x8] sm:$0xff] }
  0x15   : > { %v374_v16 = vld [vmem:[#allocation2] sm:$0xff]  ;;  %v375_v19 = vld [vmem:[#allocation2 + $0x8] sm:$0xff] }
  0x16   : > { %v406_v40 = vld [vmem:[#allocation3] sm:$0xff]  ;;  %v407_v43 = vld [vmem:[#allocation3 + $0x8] sm:$0xff] }
  0x18   : > { %685 = vmatmul.mubr.msk.bf16.vlgmr.msra.gmra.mxu0 %vm299_vm0, %v725_v3 }
  0xd8   : > { %v359_v7 = vpop.f32.mrf.mxu0 }
  0xd9   : > { %v372_v8 = vsel %vm371_vm3, %v359_v7, -1e+30 }
  0xda   : > { %v686_v9 = vpop.f32.mrf.mxu0  ;;  %v376_v10 = vsel %vm299_vm0, %v372_v8, -inf }
  0xdb   : > { %377 = vmax.xlane.f32.xlu0 %v376_v10 }
  0xdc   : > { %v362_v11 = vpop.f32.mrf.mxu0 }
  0xdd   : > { %v373_v12 = vsel %vm371_vm3, %v362_v11, -1e+30 }
  0xde   : > { %v687_v13 = vpop.f32.mrf.mxu0  ;;  %v379_v14 = vsel %vm299_vm0, %v373_v12, -inf }
  0xdf   : > { %380 = vmax.xlane.f32.xlu0 %v379_v14 }
 0x164   : > { %v378_v17 = vpop.xlane.xlu0 %377 }
 0x165   : > { %v382_v18 = vmax.f32 %v374_v16, %v378_v17 }
 0x167   : > { %v384_v20 = vsub.f32 %v374_v16, %v382_v18  ;;  %490 = vst.msk [vmem:[#allocation2] sm:$0xff] %vm294_vm2, %v382_v18  ;;  %392 = vperm.xlu1 %722, %v382_v18  }
 0x168   : > { %v381_v21 = vpop.xlane.xlu0 %380 }
 0x169   : > { %v383_v22 = vmax.f32 %v375_v19, %v381_v21  ;;  %v386_v37 = vmul.f32 1.442695, %v384_v20 }
 0x16b   : > { %v385_v23 = vsub.f32 %v375_v19, %v383_v22  ;;  %491 = vst.msk [vmem:[#allocation2 + $0x8] sm:$0xff] %vm294_vm2, %v383_v22  ;;  %397 = vperm.xlu1 %722, %v383_v22  }
 0x16d   : > { %v388_v34 = vmul.f32 1.442695, %v385_v23 }
 0x1e2   : > { %v393_v25 = vpop.permute.xlu1 %392 }
 0x1e3   : > { %v400_v26 = vsub.f32 %v372_v8, %v393_v25 }
 0x1e5   : > { %v402_v27 = vmul.f32 1.442695, %v400_v26 }
 0x1e6   : > { %v398_v28 = vpop.permute.xlu1 %397 }
 0x1e7   : > { %727 = vpow2.f32 %v402_v27  ;;  %v401_v29 = vsub.f32 %v373_v12, %v398_v28 }
 0x1e9   : > { %v404_v30 = vmul.f32 1.442695, %v401_v29 }
 0x1eb   : > { %729 = vpow2.f32 %v404_v30 }
 0x1ec   : > { %731 = vpow2.f32 %v388_v34 }
 0x1ed   : > { %733 = vpow2.f32 %v386_v37 }
 0x1f4   : > { %v728_v31 = vpop.eup %727 }
 0x1f5   : > { %v410_v32 = vsel %vm299_vm0, %v728_v31, 0.0 }
 0x1f6   : > { %411 = vadd.xlane.f32.xlu0 %v410_v32 }
 0x1f8   : > { %v730_v33 = vpop.eup %729 }
 0x1f9   : > { %v413_v35 = vsel %vm299_vm0, %v730_v33, 0.0  ;;  %v435_v36 = vpack.c.bf16 %v730_v33, %v728_v31  ;;  %v732_v38 = vpop.eup %731 }
 0x1fa   : > { %414 = vadd.xlane.f32.xlu1 %v413_v35  ;;  %v734_v39 = vpop.eup %733  ;;  %v409_v45 = vmul.f32 %v732_v38, %v407_v43 }
 0x1fb   : > { %691 = vmatmul.mubr.msk.bf16.vlgmr.msra.gmra.mxu1 %vm299_vm0, %v435_v36  ;;  %v408_v41 = vmul.f32 %v734_v39, %v406_v40 }
 0x20b   : > { %430 = vperm.xlu1 %722, %v732_v38  }
 0x20c   : > { %425 = vperm.xlu0 %723, %v734_v39  }
 0x27f   : > { %v412_v42 = vpop.xlane.xlu0 %411 }
 0x280   : > { %v416_v44 = vadd.f32 %v412_v42, %v408_v41 }
 0x282   : > { %419 = vst.msk [vmem:[#allocation3] sm:$0xff] %vm294_vm2, %v416_v44 }
 0x283   : > { %v415_v46 = vpop.xlane.xlu1 %414 }
 0x284   : > { %v417_v47 = vadd.f32 %v415_v46, %v409_v45 }
 0x286   : > { %420 = vst.msk [vmem:[#allocation3 + $0x8] sm:$0xff] %vm294_vm2, %v417_v47 }
 0x287   : > { %v426_v53 = vpop.permute.xlu0 %425  ;;  %v431_v56 = vpop.permute.xlu1 %430 }
 0x288   : > { %v433_v54 = vmul.f32 %v426_v53, %v421_v52  ;;  %v434_v60 = vmul.f32 %v431_v56, %v422_v55 }
 0x289   : > { %v497_v48 = vld [vmem:[#allocation3] sm:$0xff] }
 0x28a   : > { %735 = vrcp.f32 %v497_v48 }
 0x28d   : > { %v498_v49 = vld [vmem:[#allocation3 + $0x8] sm:$0xff] }
 0x28e   : > { %737 = vrcp.f32 %v498_v49 }
 0x297   : > { %v736_v50 = vpop.eup %735 }
 0x298   : > { %503 = vperm.xlu0 %723, %v736_v50  }
 0x29b   : > { %v738_v51 = vpop.eup %737 }
 0x29c   : > { %508 = vperm.xlu0 %723, %v738_v51  }
 0x2bb   : > { %v479_v57 = vpop.f32.mrf.mxu1 }
 0x2bc   : > { %v486_v58 = vadd.f32 %v479_v57, %v433_v54 }
 0x2bd   : > { %v692_v59 = vpop.f32.mrf.mxu1 }
 0x2be   : > { %488 = vst.msk [vmem:[#allocation4] sm:$0xff] %vm299_vm0, %v486_v58 }
 0x2bf   : > { %v482_v61 = vpop.f32.mrf.mxu1 }
 0x2c0   : > { %v487_v62 = vadd.f32 %v482_v61, %v434_v60 }
 0x2c1   : > { %v693_v63 = vpop.f32.mrf.mxu1 }
 0x2c2   : > { %489 = vst.msk [vmem:[#allocation4 + $0x8] sm:$0xff] %vm299_vm0, %v487_v62 }
 0x2c5   : > { %v495_v0 = vld [vmem:[#allocation4] sm:$0xff] }
 0x2c9   : > { %v496_v4 = vld [vmem:[#allocation4 + $0x8] sm:$0xff] }
 0x313   : > { %v504_v1 = vpop.permute.xlu0 %503 }
 0x314   : > { %v511_v2 = vmul.f32 %v504_v1, %v495_v0 }
 0x316   : > { %v676_v3 = vpack.c.bf16 %v511_v2, %v511_v2 }
 0x317   : > { %v509_v5 = vpop.permute.xlu0 %508 }
 0x318   : > { %522 = vst.msk [vmem:[%s287_s28] sm:$0xf] %vm521_vm4, %v676_v3  ;;  %v512_v6 = vmul.f32 %v509_v5, %v496_v4 }
 0x31a   : > { %v677_v7 = vpack.c.bf16 %v512_v6, %v512_v6 }
 0x31c   : > { %523 = vst.msk [vmem:[%s287_s28 + $0x4] sm:$0xf] %vm521_vm4, %v677_v7 }
 0x31d PF: > { %s13_s14 = sadd.s32 1, %s761_s14   ;;  %s855_s12 = smov %s757_s13 }
 0x31e   : > { %p10_p5 = scmp.ge.s32.totalorder %s13_s14, 10   ;;  %s856_s13 = smov %s858_s15 }
 0x320   :  { %12 = sbr.rel (!%p10_p5) target bundleno = 2 (0x2), region = 76 }

// kernel: whisper_encoder_layer.7
= control target key start
LH: loop header
LB: loop body
LE: loop exit
PB: predicated region body
PF: predicated region fallthrough
CT: control target
= control target key end

     0   :  { %vm22_vm0 = vcmask 523264   ;;  %v247_v1 = vmov 0.0   ;;  %vm187_vm1 = vcmask 519168   ;;  %s326_s1 = inlined_call_operand.vmem [shape: bf16[64,64], index: 1, kind: input, shape index: {}]   ;;  %s327_s0 = inlined_call_operand.vmem [shape: bf16[32,64], index: 0, kind: input, shape index: {}]   ;;  %s328_s3 = inlined_call_operand.vmem [shape: bf16[32,64], index: 3, kind: input, shape index: {}]   ;;  %s329_s2 = inlined_call_operand.vmem [shape: f32[1,64], index: 2, kind: input, shape index: {}]   ;;  %s330_s4 = inlined_call_operand.vmem [shape: bf16[32,64], index: 4, kind: output, shape index: {}]  }
   0x1   :  { %v241_v0 = vld [vmem:[%s326_s1 + $0x18] sm:$0xff]   ;;  %25 = vst.msk [vmem:[#allocation2 + $0x10] sm:$0xff] %vm22_vm0, %v247_v1  ;;  %23 = vst.msk [vmem:[#allocation2] sm:$0xff] %vm22_vm0, %v247_v1  ;;  %v242_v2 = vld [vmem:[%s326_s1 + $0x10] sm:$0xff]  }
   0x2   :  { %24 = vst.msk [vmem:[#allocation2 + $0x8] sm:$0xff] %vm22_vm0, %v247_v1  ;;  %26 = vst.msk [vmem:[#allocation2 + $0x18] sm:$0xff] %vm22_vm0, %v247_v1  ;;  %228 = vmatprep.subr.bf16.mxu0 %v241_v0  ;;  %v243_v3 = vld [vmem:[%s326_s1 + $0x8] sm:$0xff]   ;;  %v245_v4 = vld [vmem:[%s327_s0] sm:$0xff]  }
   0x3   :  { %229 = vmatpush3.bf16.msra.mxu0 %v241_v0  ;;  %236 = vmatprep.mubr.msk.bf16.mxu0 %vm22_vm0, %v245_v4  ;;  %v244_v5 = vld [vmem:[%s326_s1] sm:$0xff]   ;;  %v246_v6 = vld [vmem:[%s327_s0 + $0x8] sm:$0xff]  }
   0x4   :  { %230 = vmatprep.subr.bf16.mxu0 %v242_v2  ;;  %v221_v17 = vld [vmem:[%s328_s3 + $0x8] sm:$0xff]   ;;  %v204_v20 = vld [vmem:[%s329_s2] ss:$0 sm:$0xff] }
   0x5   :  { %v214_v21 = vld [vmem:[%s328_s3] sm:$0xff]   ;;  %v219_v22 = vunpack.c.l.bf16 %v221_v17  ;;  %v220_v29 = vunpack.c.h.bf16 %v221_v17 }
   0x6   :  { %v215_v25 = vunpack.c.l.bf16 %v214_v21  ;;  %v216_v34 = vunpack.c.h.bf16 %v214_v21 }
   0x7   :  { %231 = vmatpush3.bf16.msra.mxu0 %v242_v2 }
   0x8   :  { %232 = vmatprep.subr.bf16.mxu0 %v243_v3  ;;  %v33_v7 = vld [vmem:[#allocation2 + $0x10] sm:$0xff]  ;;  %v31_v9 = vld [vmem:[#allocation2] sm:$0xff] }
   0x9   :  { %v34_v12 = vld [vmem:[#allocation2 + $0x18] sm:$0xff]  ;;  %v32_v15 = vld [vmem:[#allocation2 + $0x8] sm:$0xff] }
   0xb   :  { %233 = vmatpush3.bf16.msra.mxu0 %v243_v3 }
   0xc   :  { %234 = vmatprep.subr.bf16.mxu0 %v244_v5 }
   0xf   :  { %235 = vmatpush3.bf16.msra.mxu0 %v244_v5 }
  0x12   :  { %237 = vmatmul.mubr.msk.bf16.vlgmr.msra.gmra.mxu0 %vm22_vm0, %v246_v6 }
  0xd2   :  { %v238_v8 = vpop.f32.mrf.mxu0 }
  0xd3   :  { %v135_v10 = vadd.f32 %v238_v8, %v33_v7 }
  0xd4   :  { %v118_v11 = vpop.f32.mrf.mxu0 }
  0xd5   :  { %139 = vst.msk [vmem:[#allocation2 + $0x10] sm:$0xff] %vm22_vm0, %v135_v10  ;;  %v133_v13 = vadd.f32 %v118_v11, %v31_v9 }
  0xd6   :  { %v239_v14 = vpop.f32.mrf.mxu0 }
  0xd7   :  { %137 = vst.msk [vmem:[#allocation2] sm:$0xff] %vm22_vm0, %v133_v13  ;;  %v136_v16 = vadd.f32 %v239_v14, %v34_v12 }
  0xd8   :  { %v121_v18 = vpop.f32.mrf.mxu0 }
  0xd9   :  { %140 = vst.msk [vmem:[#allocation2 + $0x18] sm:$0xff] %vm22_vm0, %v136_v16  ;;  %v134_v19 = vadd.f32 %v121_v18, %v32_v15 }
  0xdb   :  { %138 = vst.msk [vmem:[#allocation2 + $0x8] sm:$0xff] %vm22_vm0, %v134_v19 }
  0xdc   :  { %v146_v23 = vld [vmem:[#allocation2 + $0x10] sm:$0xff] }
  0xdd   :  { %v157_v24 = vadd.f32 %v204_v20, %v146_v23 }
  0xde   :  { %v144_v26 = vld [vmem:[#allocation2] sm:$0xff] }
  0xdf   :  { %v169_v27 = vadd.f32 %v219_v22, %v157_v24  ;;  %v155_v28 = vadd.f32 %v204_v20, %v144_v26 }
  0xe0   :  { %v147_v30 = vld [vmem:[#allocation2 + $0x18] sm:$0xff] }
  0xe1   :  { %v211_v31 = vpack.c.bf16 %v169_v27, %v169_v27  ;;  %v167_v32 = vadd.f32 %v215_v25, %v155_v28  ;;  %v158_v33 = vadd.f32 %v204_v20, %v147_v30 }
  0xe2   :  { %v145_v35 = vld [vmem:[#allocation2 + $0x8] sm:$0xff] }
  0xe3   :  { %190 = vst.msk [vmem:[%s330_s4 + $0x8] sm:$0xf] %vm187_vm1, %v211_v31  ;;  %v209_v36 = vpack.c.bf16 %v167_v32, %v167_v32  ;;  %v170_v37 = vadd.f32 %v220_v29, %v158_v33  ;;  %v156_v38 = vadd.f32 %v204_v20, %v145_v35 }
  0xe5   :  { %188 = vst.msk [vmem:[%s330_s4] sm:$0xf] %vm187_vm1, %v209_v36  ;;  %v212_v39 = vpack.c.bf16 %v170_v37, %v170_v37  ;;  %v168_v40 = vadd.f32 %v216_v34, %v156_v38 }
  0xe7   :  { %191 = vst.msk [vmem:[%s330_s4 + $0xc] sm:$0xf] %vm187_vm1, %v212_v39  ;;  %v210_v41 = vpack.c.bf16 %v168_v40, %v168_v40 }
  0xe9   :  { %189 = vst.msk [vmem:[%s330_s4 + $0x4] sm:$0xf] %vm187_vm1, %v210_v41 }

// kernel: whisper_encoder_layer.8
= control target key start
LH: loop header
LB: loop body
LE: loop exit
PB: predicated region body
PF: predicated region fallthrough
CT: control target
= control target key end

     0   :  { %vm41_vm0 = vcmask 523264   ;;  %vm133_vm1 = vcmask 519168   ;;  %s494_s0 = inlined_call_operand.vmem [shape: bf16[32,64], index: 0, kind: input, shape index: {}]   ;;  %s495_s1 = inlined_call_operand.vmem [shape: bf16[64,128], index: 1, kind: input, shape index: {}]   ;;  %s496_s3 = inlined_call_operand.vmem [shape: f32[1,64], index: 3, kind: input, shape index: {}]   ;;  %s497_s4 = inlined_call_operand.vmem [shape: f32[1,64], index: 4, kind: input, shape index: {}]   ;;  %s498_s2 = inlined_call_operand.vmem [shape: f32[1,128], index: 2, kind: input, shape index: {}]   ;;  %s499_s5 = inlined_call_operand.vmem [shape: bf16[32,128], index: 5, kind: output, shape index: {}]  }
   0x1   :  { %v358_v0 = vld [vmem:[%s494_s0] sm:$0xff]   ;;  %v375_v1 = vld [vmem:[%s494_s0 + $0x8] sm:$0xff]   ;;  %v395_v30 = vld [vmem:[%s495_s1 + $0x18] sm:$0xff]  }
   0x2   :  { %v359_v2 = vunpack.c.l.bf16 %v358_v0  ;;  %v363_v3 = vunpack.c.l.bf16 %v375_v1  ;;  %v360_v4 = vunpack.c.h.bf16 %v358_v0  ;;  %v364_v5 = vunpack.c.h.bf16 %v375_v1  ;;  %383 = vmatprep.subr.bf16.mxu0 %v395_v30  ;;  %v396_v31 = vld [vmem:[%s495_s1 + $0x10] sm:$0xff]   ;;  %v397_v32 = vld [vmem:[%s495_s1 + $0x8] sm:$0xff]   ;;  %v398_v33 = vld [vmem:[%s495_s1] sm:$0xff]  }
   0x3   :  { %384 = vmatpush3.bf16.msra.mxu0 %v395_v30  ;;  %v330_v47 = vld [vmem:[%s496_s3] ss:$0 sm:$0xff] }
   0x4   :  { %v42_v6 = vsel %vm41_vm0, %v359_v2, 0.0  ;;  %v48_v7 = vsel %vm41_vm0, %v363_v3, 0.0  ;;  %v45_v8 = vsel %vm41_vm0, %v360_v4, 0.0  ;;  %v51_v9 = vsel %vm41_vm0, %v364_v5, 0.0  ;;  %385 = vmatprep.subr.bf16.mxu0 %v396_v31  ;;  %v331_v49 = vld [vmem:[%s497_s4] ss:$0 sm:$0xff] }
   0x5   :  { %43 = vadd.xlane.f32.xlu0 %v42_v6  ;;  %49 = vadd.xlane.f32.xlu1 %v48_v7  ;;  %v344_v6 = vld [vmem:[%s498_s2] ss:$0 sm:$0xff] }
   0x7   :  { %386 = vmatpush3.bf16.msra.mxu0 %v396_v31 }
   0x8   :  { %387 = vmatprep.subr.bf16.mxu0 %v397_v32 }
   0x9   :  { %46 = vadd.xlane.f32.xlu0 %v45_v8  ;;  %52 = vadd.xlane.f32.xlu1 %v51_v9 }
   0xb   :  { %388 = vmatpush3.bf16.msra.mxu0 %v397_v32 }
   0xc   :  { %389 = vmatprep.subr.bf16.mxu0 %v398_v33 }
   0xf   :  { %390 = vmatpush3.bf16.msra.mxu0 %v398_v33 }
  0x8e   :  { %v44_v10 = vpop.xlane.xlu0 %43  ;;  %v50_v11 = vpop.xlane.xlu1 %49 }
  0x8f   :  { %v55_v12 = vmul.f32 0.015625, %v44_v10  ;;  %v57_v13 = vmul.f32 0.015625, %v50_v11 }
  0x91   :  { %v59_v14 = vsub.f32 %v359_v2, %v55_v12  ;;  %v61_v15 = vsub.f32 %v363_v3, %v57_v13 }
  0x92   :  { %v47_v16 = vpop.xlane.xlu0 %46  ;;  %v53_v17 = vpop.xlane.xlu1 %52 }
  0x93   :  { %v56_v18 = vmul.f32 0.015625, %v47_v16  ;;  %v58_v19 = vmul.f32 0.015625, %v53_v17  ;;  %v63_v20 = vmul.f32 %v59_v14, %v59_v14  ;;  %v65_v21 = vmul.f32 %v61_v15, %v61_v15 }
  0x95   :  { %v60_v22 = vsub.f32 %v360_v4, %v56_v18  ;;  %v62_v23 = vsub.f32 %v364_v5, %v58_v19  ;;  %v67_v24 = vsel %vm41_vm0, %v63_v20, 0.0  ;;  %v73_v25 = vsel %vm41_vm0, %v65_v21, 0.0 }
  0x96   :  { %68 = vadd.xlane.f32.xlu0 %v67_v24 }
  0x97   :  { %v64_v26 = vmul.f32 %v60_v22, %v60_v22  ;;  %v66_v27 = vmul.f32 %v62_v23, %v62_v23 }
  0x99   :  { %v70_v28 = vsel %vm41_vm0, %v64_v26, 0.0  ;;  %v76_v29 = vsel %vm41_vm0, %v66_v27, 0.0 }
  0x9a   :  { %74 = vadd.xlane.f32.xlu0 %v73_v25  ;;  %71 = vadd.xlane.f32.xlu1 %v70_v28 }
  0x9e   :  { %77 = vadd.xlane.f32.xlu1 %v76_v29 }
 0x11f   :  { %v69_v34 = vpop.xlane.xlu0 %68 }
 0x120   :  { %v79_v35 = vmul.f32 0.015625, %v69_v34 }
 0x122   :  { %v83_v36 = vadd.f32 1e-05, %v79_v35 }
 0x123   :  { %v72_v37 = vpop.xlane.xlu1 %71  ;;  %v75_v38 = vpop.xlane.xlu0 %74 }
 0x124   :  { %401 = vrsqrt.f32 %v83_v36  ;;  %v80_v39 = vmul.f32 0.015625, %v72_v37  ;;  %v81_v40 = vmul.f32 0.015625, %v75_v38 }
 0x126   :  { %v84_v41 = vadd.f32 1e-05, %v80_v39  ;;  %v85_v42 = vadd.f32 1e-05, %v81_v40 }
 0x127   :  { %v78_v43 = vpop.xlane.xlu1 %77 }
 0x128   :  { %403 = vrsqrt.f32 %v84_v41  ;;  %v82_v44 = vmul.f32 0.015625, %v78_v43 }
 0x129   :  { %405 = vrsqrt.f32 %v85_v42 }
 0x12a   :  { %v86_v45 = vadd.f32 1e-05, %v82_v44 }
 0x12c   :  { %407 = vrsqrt.f32 %v86_v45 }
 0x131   :  { %v402_v46 = vpop.eup %401 }
 0x132   :  { %v91_v48 = vmul.f32 %v402_v46, %v59_v14 }
 0x134   :  { %v102_v50 = vmul.f32 %v330_v47, %v91_v48 }
 0x135   :  { %v404_v51 = vpop.eup %403 }
 0x136   :  { %v406_v52 = vpop.eup %405  ;;  %v113_v53 = vadd.f32 %v331_v49, %v102_v50  ;;  %v92_v54 = vmul.f32 %v404_v51, %v60_v22 }
 0x137   :  { %v93_v55 = vmul.f32 %v406_v52, %v61_v15 }
 0x138   :  { %v349_v56 = vpack.c.bf16 %v113_v53, %v113_v53  ;;  %v103_v57 = vmul.f32 %v330_v47, %v92_v54 }
 0x139   :  { %v408_v58 = vpop.eup %407  ;;  %v104_v59 = vmul.f32 %v330_v47, %v93_v55 }
 0x13a   :  { %134 = vst.msk [vmem:[#allocation3] sm:$0xf] %vm133_vm1, %v349_v56  ;;  %v114_v60 = vadd.f32 %v331_v49, %v103_v57  ;;  %v94_v61 = vmul.f32 %v408_v58, %v62_v23 }
 0x13b   :  { %v115_v62 = vadd.f32 %v331_v49, %v104_v59 }
 0x13c   :  { %v350_v63 = vpack.c.bf16 %v114_v60, %v114_v60  ;;  %v105_v0 = vmul.f32 %v330_v47, %v94_v61 }
 0x13d   :  { %v351_v1 = vpack.c.bf16 %v115_v62, %v115_v62 }
 0x13e   :  { %135 = vst.msk [vmem:[#allocation3 + $0x4] sm:$0xf] %vm133_vm1, %v350_v63  ;;  %v116_v2 = vadd.f32 %v331_v49, %v105_v0 }
 0x13f   :  { %136 = vst.msk [vmem:[#allocation3 + $0x8] sm:$0xf] %vm133_vm1, %v351_v1 }
 0x140   :  { %v352_v3 = vpack.c.bf16 %v116_v2, %v116_v2 }
 0x142   :  { %137 = vst.msk [vmem:[#allocation3 + $0xc] sm:$0xf] %vm133_vm1, %v352_v3 }
 0x145   :  { %v399_v4 = vld [vmem:[#allocation3] sm:$0xff]  }
 0x146   :  { %391 = vmatprep.mubr.msk.bf16.mxu0 %vm41_vm0, %v399_v4 }
 0x149   :  { %v400_v5 = vld [vmem:[#allocation3 + $0x8] sm:$0xff]  }
 0x14a   :  { %392 = vmatmul.mubr.msk.bf16.vlgmr.msra.gmra.mxu0 %vm41_vm0, %v400_v5 }
 0x20a   :  { %v393_v7 = vpop.f32.mrf.mxu0 }
 0x20b   :  { %v268_v8 = vadd.f32 %v393_v7, %v344_v6 }
 0x20c   :  { %v229_v9 = vpop.f32.mrf.mxu0 }
 0x20d   :  { %v272_v10 = vmul.f32 %v268_v8, %v268_v8  ;;  %v266_v11 = vadd.f32 %v344_v6, %v229_v9 }
 0x20e   :  { %v394_v12 = vpop.f32.mrf.mxu0 }
 0x20f   :  { %v276_v13 = vmul.f32 %v272_v10, %v268_v8  ;;  %v270_v14 = vmul.f32 %v266_v11, %v266_v11  ;;  %v269_v15 = vadd.f32 %v394_v12, %v344_v6 }
 0x210   :  { %v232_v16 = vpop.f32.mrf.mxu0 }
 0x211   :  { %v280_v17 = vmul.f32 0.044715, %v276_v13  ;;  %v274_v18 = vmul.f32 %v270_v14, %v266_v11  ;;  %v273_v19 = vmul.f32 %v269_v15, %v269_v15  ;;  %v267_v20 = vadd.f32 %v344_v6, %v232_v16 }
 0x213   :  { %v284_v21 = vadd.f32 %v280_v17, %v268_v8  ;;  %v278_v22 = vmul.f32 0.044715, %v274_v18  ;;  %v277_v23 = vmul.f32 %v273_v19, %v269_v15  ;;  %v271_v24 = vmul.f32 %v267_v20, %v267_v20 }
 0x215   :  { %v288_v25 = vmul.f32 0.7978846, %v284_v21  ;;  %v282_v26 = vadd.f32 %v278_v22, %v266_v11  ;;  %v281_v27 = vmul.f32 0.044715, %v277_v23  ;;  %v275_v28 = vmul.f32 %v271_v24, %v267_v20 }
 0x217   :  { %409 = vtanh.f32 %v288_v25  ;;  %v286_v29 = vmul.f32 0.7978846, %v282_v26  ;;  %v285_v30 = vadd.f32 %v281_v27, %v269_v15  ;;  %v279_v31 = vmul.f32 0.044715, %v275_v28 }
 0x219   :  { %411 = vtanh.f32 %v286_v29  ;;  %v289_v32 = vmul.f32 0.7978846, %v285_v30  ;;  %v283_v33 = vadd.f32 %v279_v31, %v267_v20 }
 0x21b   :  { %413 = vtanh.f32 %v289_v32  ;;  %v287_v34 = vmul.f32 0.7978846, %v283_v33 }
 0x21d   :  { %415 = vtanh.f32 %v287_v34 }
 0x224   :  { %v410_v35 = vpop.eup %409 }
 0x225   :  { %v296_v36 = vadd.f32 1.0, %v410_v35 }
 0x226   :  { %v412_v37 = vpop.eup %411 }
 0x227   :  { %v294_v38 = vadd.f32 1.0, %v412_v37  ;;  %v300_v40 = vmul.f32 0.5, %v296_v36 }
 0x228   :  { %v414_v39 = vpop.eup %413 }
 0x229   :  { %v297_v41 = vadd.f32 1.0, %v414_v39  ;;  %v298_v43 = vmul.f32 0.5, %v294_v38  ;;  %v304_v46 = vmul.f32 %v300_v40, %v268_v8 }
 0x22a   :  { %v416_v42 = vpop.eup %415 }
 0x22b   :  { %v301_v44 = vmul.f32 0.5, %v297_v41  ;;  %v295_v45 = vadd.f32 1.0, %v416_v42  ;;  %v302_v49 = vmul.f32 %v298_v43, %v266_v11 }
 0x22d   :  { %v305_v47 = vmul.f32 %v301_v44, %v269_v15  ;;  %v299_v48 = vmul.f32 0.5, %v295_v45 }
 0x22f   :  { %v373_v50 = vpack.c.bf16 %v305_v47, %v304_v46  ;;  %v303_v51 = vmul.f32 %v299_v48, %v267_v20 }
 0x231   :  { %376 = vst [vmem:[%s499_s5 + $0x8] sm:$0xff] %v373_v50   ;;  %v368_v52 = vpack.c.bf16 %v303_v51, %v302_v49 }
 0x233   :  { %369 = vst [vmem:[%s499_s5] sm:$0xff] %v368_v52  }

// kernel: whisper_encoder_layer.9
= control target key start
LH: loop header
LB: loop body
LE: loop exit
PB: predicated region body
PF: predicated region fallthrough
CT: control target
= control target key end

     0   :  { %vm22_vm0 = vcmask 523264   ;;  %v268_v1 = vmov 0.0   ;;  %s357_s1 = inlined_call_operand.vmem [shape: bf16[128,64], index: 1, kind: input, shape index: {}]   ;;  %s358_s0 = inlined_call_operand.vmem [shape: bf16[32,128], index: 0, kind: input, shape index: {}]   ;;  %s359_s3 = inlined_call_operand.vmem [shape: bf16[32,64], index: 3, kind: input, shape index: {}]   ;;  %s360_s2 = inlined_call_operand.vmem [shape: f32[1,64], index: 2, kind: input, shape index: {}]   ;;  %s361_s4 = inlined_call_operand.vmem [shape: f32[32,64], index: 4, kind: output, shape index: {}]  }
   0x1   :  { %v258_v0 = vld [vmem:[%s357_s1 + $0x38] sm:$0xff]   ;;  %25 = vst.msk [vmem:[#allocation2 + $0x10] sm:$0xff] %vm22_vm0, %v268_v1  ;;  %23 = vst.msk [vmem:[#allocation2] sm:$0xff] %vm22_vm0, %v268_v1  ;;  %v259_v2 = vld [vmem:[%s357_s1 + $0x30] sm:$0xff]  }
   0x2   :  { %24 = vst.msk [vmem:[#allocation2 + $0x8] sm:$0xff] %vm22_vm0, %v268_v1  ;;  %26 = vst.msk [vmem:[#allocation2 + $0x18] sm:$0xff] %vm22_vm0, %v268_v1  ;;  %237 = vmatprep.subr.bf16.mxu0 %v258_v0  ;;  %v260_v3 = vld [vmem:[%s357_s1 + $0x28] sm:$0xff]   ;;  %v261_v4 = vld [vmem:[%s357_s1 + $0x20] sm:$0xff]  }
   0x3   :  { %238 = vmatpush3.bf16.msra.mxu0 %v258_v0  ;;  %v266_v5 = vld [vmem:[%s358_s0] sm:$0xff]   ;;  %v262_v6 = vld [vmem:[%s357_s1 + $0x18] sm:$0xff]   ;;  %v263_v7 = vld [vmem:[%s357_s1 + $0x10] sm:$0xff]  }
   0x4   :  { %239 = vmatprep.subr.bf16.mxu0 %v259_v2  ;;  %253 = vmatprep.mubr.bf16.mxu0 %v266_v5  ;;  %v264_v8 = vld [vmem:[%s357_s1 + $0x8] sm:$0xff]   ;;  %v265_v9 = vld [vmem:[%s357_s1] sm:$0xff]  }
   0x5   :  { %v267_v10 = vld [vmem:[%s358_s0 + $0x8] sm:$0xff]   ;;  %v217_v24 = vld [vmem:[%s360_s2] ss:$0 sm:$0xff] }
   0x6   :  { %v226_v21 = vld [vmem:[%s359_s3 + $0x8] sm:$0xff]   ;;  %v219_v25 = vld [vmem:[%s359_s3] sm:$0xff]  }
   0x7   :  { %240 = vmatpush3.bf16.msra.mxu0 %v259_v2  ;;  %v224_v26 = vunpack.c.l.bf16 %v226_v21  ;;  %v220_v29 = vunpack.c.l.bf16 %v219_v25  ;;  %v225_v33 = vunpack.c.h.bf16 %v226_v21  ;;  %v221_v37 = vunpack.c.h.bf16 %v219_v25 }
   0x8   :  { %241 = vmatprep.subr.bf16.mxu0 %v260_v3  ;;  %v33_v11 = vld [vmem:[#allocation2 + $0x10] sm:$0xff]  ;;  %v31_v13 = vld [vmem:[#allocation2] sm:$0xff] }
   0x9   :  { %v34_v16 = vld [vmem:[#allocation2 + $0x18] sm:$0xff]  ;;  %v32_v19 = vld [vmem:[#allocation2 + $0x8] sm:$0xff] }
   0xb   :  { %242 = vmatpush3.bf16.msra.mxu0 %v260_v3 }
   0xc   :  { %243 = vmatprep.subr.bf16.mxu0 %v261_v4 }
   0xf   :  { %244 = vmatpush3.bf16.msra.mxu0 %v261_v4 }
  0x10   :  { %245 = vmatprep.subr.bf16.mxu0 %v262_v6 }
  0x13   :  { %246 = vmatpush3.bf16.msra.mxu0 %v262_v6 }
  0x14   :  { %247 = vmatprep.subr.bf16.mxu0 %v263_v7 }
  0x17   :  { %248 = vmatpush3.bf16.msra.mxu0 %v263_v7 }
  0x18   :  { %249 = vmatprep.subr.bf16.mxu0 %v264_v8 }
  0x1b   :  { %250 = vmatpush3.bf16.msra.mxu0 %v264_v8 }
  0x1c   :  { %251 = vmatprep.subr.bf16.mxu0 %v265_v9 }
  0x1f   :  { %252 = vmatpush3.bf16.msra.mxu0 %v265_v9 }
  0x22   :  { %254 = vmatmul.mubr.bf16.vlgmr.msra.gmra.mxu0 %v267_v10 }
  0xe2   :  { %v255_v12 = vpop.f32.mrf.mxu0 }
  0xe3   :  { %v162_v14 = vadd.f32 %v255_v12, %v33_v11 }
  0xe4   :  { %v145_v15 = vpop.f32.mrf.mxu0 }
  0xe5   :  { %167 = vst.msk [vmem:[#allocation2 + $0x10] sm:$0xff] %vm22_vm0, %v162_v14  ;;  %v160_v17 = vadd.f32 %v145_v15, %v31_v13 }
  0xe6   :  { %v256_v18 = vpop.f32.mrf.mxu0 }
  0xe7   :  { %165 = vst.msk [vmem:[#allocation2] sm:$0xff] %vm22_vm0, %v160_v17  ;;  %v163_v20 = vadd.f32 %v256_v18, %v34_v16 }
  0xe8   :  { %v148_v22 = vpop.f32.mrf.mxu0 }
  0xe9   :  { %168 = vst.msk [vmem:[#allocation2 + $0x18] sm:$0xff] %vm22_vm0, %v163_v20  ;;  %v161_v23 = vadd.f32 %v148_v22, %v32_v19 }
  0xeb   :  { %166 = vst.msk [vmem:[#allocation2 + $0x8] sm:$0xff] %vm22_vm0, %v161_v23 }
  0xec   :  { %v174_v27 = vld [vmem:[#allocation2 + $0x10] sm:$0xff] }
  0xed   :  { %v185_v28 = vadd.f32 %v217_v24, %v174_v27 }
  0xee   :  { %v172_v30 = vld [vmem:[#allocation2] sm:$0xff] }
  0xef   :  { %v197_v31 = vadd.f32 %v224_v26, %v185_v28  ;;  %v183_v32 = vadd.f32 %v217_v24, %v172_v30 }
  0xf0   :  { %v175_v34 = vld [vmem:[#allocation2 + $0x18] sm:$0xff] }
  0xf1   :  { %201 = vst.msk [vmem:[%s361_s4 + $0x10] sm:$0xff] %vm22_vm0, %v197_v31  ;;  %v195_v35 = vadd.f32 %v220_v29, %v183_v32  ;;  %v186_v36 = vadd.f32 %v217_v24, %v175_v34 }
  0xf2   :  { %v173_v38 = vld [vmem:[#allocation2 + $0x8] sm:$0xff] }
  0xf3   :  { %199 = vst.msk [vmem:[%s361_s4] sm:$0xff] %vm22_vm0, %v195_v35  ;;  %v198_v39 = vadd.f32 %v225_v33, %v186_v36  ;;  %v184_v40 = vadd.f32 %v217_v24, %v173_v38 }
  0xf5   :  { %202 = vst.msk [vmem:[%s361_s4 + $0x18] sm:$0xff] %vm22_vm0, %v198_v39  ;;  %v196_v41 = vadd.f32 %v221_v37, %v184_v40 }
  0xf7   :  { %200 = vst.msk [vmem:[%s361_s4 + $0x8] sm:$0xff] %vm22_vm0, %v196_v41 }

</bundles_post_ra>
